<compile_context>
chip_gen: v7x
topology: tpu7x:2x2x1
jax: 0.10.0
libtpu: 0.0.40
codegen_flags: <defaults>
</compile_context>

<pallas_src>
import functools

import jax
import jax.numpy as jnp
from jax.experimental import pallas as pl
from jax.experimental.pallas import tpu as pltpu


# ----------------------------------------------------------------------------
# Generation-aware VMEM configuration (host side, cached).
# ----------------------------------------------------------------------------
@functools.lru_cache(maxsize=None)
def _vmem_config():
    """Returns (batch-tile VMEM budget bytes, vmem_limit_bytes) for this chip."""
    try:
        cap = int(pltpu.get_tpu_info().vmem_capacity_bytes)
    except Exception:
        cap = 64 * 1024 * 1024  # conservative (v7x-sized) fallback
    if cap <= 64 * 1024 * 1024:                      # v7x: 64 MiB per TensorCore
        return 20 * 1024 * 1024, 36 * 1024 * 1024
    return 40 * 1024 * 1024, 64 * 1024 * 1024        # v5e / v6e: 128 MiB


# ----------------------------------------------------------------------------
# Kernel
# ----------------------------------------------------------------------------
def _fused_gradient_loss_kernel(pred_ref, targ_ref, mask_ref, out_ref, *,
                                scales, use_roll, compute_dtype):
    """Per-batch-tile partial sums for all scales.

    Output tile layout, shape (8, 128) float32:
      row 0, lane s : sum of masked gradient terms for scale s
      row 1, lane s : sum of (downsampled) mask entries for scale s (divisor)
    """
    cd = compute_dtype
    p = pred_ref[...].astype(cd)          # (bt, h, w)
    t = targ_ref[...].astype(cd)
    m = mask_ref[...].astype(cd)
    bt, h, w = p.shape

    pt = p - t                            # shared by every scale

    # (1, h, w) index grids, broadcast over the batch tile; used for the
    # per-scale downsample-selection masks and roll boundary validity.
    row = jax.lax.broadcasted_iota(jnp.int32, (1, h, w), 1)
    col = jax.lax.broadcasted_iota(jnp.int32, (1, h, w), 2)

    # One-time detection of the rotate sign convention (fwd_* is all-true or
    # all-false), so boundary-validity masks are correct either way.
    fwd_x = fwd_y = None
    if use_roll and w > 1:
        r1 = pltpu.roll(col, w - 1, axis=2)
        fwd_x = r1 == jnp.where(col + 1 >= w, col + 1 - w, col + 1)
    if use_roll and h > 1:
        r1 = pltpu.roll(row, h - 1, axis=1)
        fwd_y = r1 == jnp.where(row + 1 >= h, row + 1 - h, row + 1)

    g_sums = []
    m_sums = []
    for s in range(scales):
        step = 1 << s
        if s == 0:
            msk = m
            md = m * pt
        else:
            # Keep only every `step`-th row/col (== the PyTorch
            # [:, ::step, ::step] downsample); zeroed positions can never
            # contribute to the masked products below.
            sel = (((row & (step - 1)) == 0)
                   & ((col & (step - 1)) == 0)).astype(cd)
            msk = m * sel
            md = msk * pt

        if use_roll:
            g = None
            if step < w:   # x-gradient: columns `step` apart (lane roll, XLU)
                md_x = pltpu.roll(md, w - step, axis=2)
                mk_x = pltpu.roll(msk, w - step, axis=2)
                vx = jnp.where(fwd_x, col < (w - step), col >= step).astype(cd)
                g = jnp.abs(md_x - md) * (mk_x * msk) * vx
            if step < h:   # y-gradient: rows `step` apart (sublane roll, XLU)
                md_y = pltpu.roll(md, h - step, axis=1)
                mk_y = pltpu.roll(msk, h - step, axis=1)
                vy = jnp.where(fwd_y, row < (h - step), row >= step).astype(cd)
                gy = jnp.abs(md_y - md) * (mk_y * msk) * vy
                g = gy if g is None else g + gy
            gsum = (jnp.float32(0.0) if g is None
                    else jnp.sum(g.astype(jnp.float32)))
        else:
            # Fallback: shifted-slice formulation (always lowers).
            gsum = jnp.float32(0.0)
            if step < w:
                gx = jnp.abs(md[:, :, step:] - md[:, :, :-step]) * (
                    msk[:, :, step:] * msk[:, :, :-step])
                gsum = gsum + jnp.sum(gx.astype(jnp.float32))
            if step < h:
                gy = jnp.abs(md[:, step:, :] - md[:, :-step, :]) * (
                    msk[:, step:, :] * msk[:, :-step, :])
                gsum = gsum + jnp.sum(gy.astype(jnp.float32))

        g_sums.append(gsum)
        m_sums.append(jnp.sum(msk.astype(jnp.float32)))

    # Pack the 2*scales scalars into one lane-aligned (8, 128) tile, stored once.
    lane = jax.lax.broadcasted_iota(jnp.int32, (8, 128), 1)
    sub = jax.lax.broadcasted_iota(jnp.int32, (8, 128), 0)
    acc = jnp.zeros((8, 128), jnp.float32)
    for s in range(scales):
        acc = jnp.where((sub == 0) & (lane == s), g_sums[s], acc)
        acc = jnp.where((sub == 1) & (lane == s), m_sums[s], acc)
    out_ref[0] = acc


# ----------------------------------------------------------------------------
# Wrapper
# ----------------------------------------------------------------------------
def _pick_batch_tile(n, h, w, in_itemsize, compute_itemsize, budget_bytes,
                     max_tile=8):
    """Largest batch-tile divisor of n fitting the VMEM budget; prefers >= 2
    grid steps (megacore sharding + DMA/compute overlap)."""
    # 3 inputs x 2 pipeline buffers + ~10 full-size compute-dtype temporaries.
    per_image = (3 * 2 * max(int(in_itemsize), 1)
                 + 10 * int(compute_itemsize)) * h * w
    cap = int(max(1, min(max_tile, budget_bytes // max(per_image, 1))))
    divisors = [d for d in range(1, min(n, cap) + 1) if n % d == 0]
    preferred = [d for d in divisors if n // d >= 2]
    return (preferred or divisors)[-1]


@functools.partial(jax.jit,
                   static_argnames=("scales", "use_roll", "budget_bytes",
                                    "vmem_limit_bytes"))
def _gradient_loss_impl(prediction, target, mask, *, scales, use_roll,
                        budget_bytes, vmem_limit_bytes):
    n, h, w = prediction.shape
    assert target.shape == (n, h, w) and mask.shape == (n, h, w)
    assert 1 <= scales <= 128

    # bf16 inputs keep elementwise math in bf16 (v6e/v7x VPU density);
    # reductions always accumulate in f32.
    compute_dtype = (jnp.bfloat16 if prediction.dtype == jnp.bfloat16
                     else jnp.float32)

    bt = _pick_batch_tile(n, h, w,
                          jnp.dtype(prediction.dtype).itemsize,
                          jnp.dtype(compute_dtype).itemsize,
                          budget_bytes)
    num_blocks = n // bt

    kernel = functools.partial(_fused_gradient_loss_kernel, scales=scales,
                               use_roll=use_roll, compute_dtype=compute_dtype)
    in_spec = pl.BlockSpec((bt, h, w), lambda i: (i, 0, 0))

    bytes_in = (prediction.size * prediction.dtype.itemsize
                + target.size * target.dtype.itemsize
                + mask.size * mask.dtype.itemsize)
    cost = pl.CostEstimate(
        flops=int(16 * scales * n * h * w),
        transcendentals=0,
        bytes_accessed=int(bytes_in) + num_blocks * 8 * 128 * 4,
    )

    parts = pl.pallas_call(
        kernel,
        out_shape=jax.ShapeDtypeStruct((num_blocks, 8, 128), jnp.float32),
        grid=(num_blocks,),
        in_specs=[in_spec, in_spec, in_spec],
        out_specs=pl.BlockSpec((1, 8, 128), lambda i: (i, 0, 0)),
        compiler_params=pltpu.CompilerParams(
            dimension_semantics=("parallel",),
            vmem_limit_bytes=vmem_limit_bytes,
        ),
        cost_estimate=cost,
    )(prediction, target, mask)

    gsums = jnp.sum(parts[:, 0, :scales], axis=0)   # (scales,)
    msums = jnp.sum(parts[:, 1, :scales], axis=0)   # (scales,)
    safe = jnp.where(msums == 0.0, 1.0, msums)
    per_scale = jnp.where(msums == 0.0, 0.0, gsums / safe)
    return jnp.sum(per_scale)


_ROLL_FALLBACK = False


def gradient_loss(prediction, target, mask, scales=4):
    """Equivalent of GradientLoss(scales=scales, reduction='batch-based').forward."""
    global _ROLL_FALLBACK
    budget_bytes, vmem_limit_bytes = _vmem_config()
    kwargs = dict(scales=scales, budget_bytes=budget_bytes,
                  vmem_limit_bytes=vmem_limit_bytes)
    if not _ROLL_FALLBACK:
        try:
            return _gradient_loss_impl(prediction, target, mask,
                                       use_roll=True, **kwargs)
        except Exception:
            # pltpu.roll did not lower for these shapes on this generation;
            # fall back to the slice-based formulation from now on.
            _ROLL_FALLBACK = True
    return _gradient_loss_impl(prediction, target, mask,
                               use_roll=False, **kwargs)


# ----------------------------------------------------------------------------
# Pure-JAX reference (sanity check, mirrors the PyTorch code)
# ----------------------------------------------------------------------------
def _reference_gradient_loss(prediction, target, mask, scales=4):
    def one_scale(p, t, m):
        M = jnp.sum(m, axis=(1, 2))
        diff = m * (p - t)
        gx = jnp.abs(diff[:, :, 1:] - diff[:, :, :-1]) * (m[:, :, 1:] * m[:, :, :-1])
        gy = jnp.abs(diff[:, 1:, :] - diff[:, :-1, :]) * (m[:, 1:, :] * m[:, :-1, :])
        image_loss = jnp.sum(gx, axis=(1, 2)) + jnp.sum(gy, axis=(1, 2))
        div = jnp.sum(M)
        return jnp.where(div == 0.0, 0.0,
                         jnp.sum(image_loss) / jnp.where(div == 0.0, 1.0, div))

    total = jnp.float32(0.0)
    for scale in range(scales):
        step = 2 ** scale
        total = total + one_scale(prediction[:, ::step, ::step],
                                  target[:, ::step, ::step],
                                  mask[:, ::step, ::step])
    return total


if __name__ == "__main__":
    key = jax.random.PRNGKey(0)
    k1, k2, k3 = jax.random.split(key, 3)

    N, H, W = 2, 16, 16
    prediction = jax.random.normal(k1, (N, H, W), dtype=jnp.float32)
    target = jax.random.normal(k2, (N, H, W), dtype=jnp.float32)
    mask = (jax.random.uniform(k3, (N, H, W)) > 0.3).astype(jnp.float32)

    out = gradient_loss(prediction, target, mask, scales=4)
    out = jax.block_until_ready(out)

    ref = _reference_gradient_loss(prediction, target, mask, scales=4)
    assert jnp.allclose(out, ref, rtol=1e-5, atol=1e-5), (out, ref)

    print("KERNEL_OK")
</pallas_src>

<mosaic_0001>
module attributes {stable_mosaic.version = 11 : i64} {
  func.func @_fused_gradient_loss_kernel(%arg0: i32, %arg1: memref<1x16x16xf32, #tpu.memory_space<vmem>>, %arg2: memref<1x16x16xf32, #tpu.memory_space<vmem>>, %arg3: memref<1x16x16xf32, #tpu.memory_space<vmem>>, %arg4: memref<1x8x128xf32, #tpu.memory_space<vmem>>) attributes {dimension_semantics = [#tpu.dimension_semantics<parallel>], iteration_bounds = array<i64: 2>, scalar_prefetch = 0 : i64, scratch_operands = 0 : i64, tpu.core_type = #tpu.core_type<tc>, window_params = [{transform_indices = @transform_0, window_bounds = array<i64: 1, 16, 16>}, {transform_indices = @transform_1, window_bounds = array<i64: 1, 16, 16>}, {transform_indices = @transform_2, window_bounds = array<i64: 1, 16, 16>}, {transform_indices = @transform_3, window_bounds = array<i64: 1, 8, 128>}]} {
    %c0 = arith.constant 0 : index
    %c0_0 = arith.constant 0 : index
    %c0_1 = arith.constant 0 : index
    %0 = vector.load %arg1[%c0, %c0_0, %c0_1] : memref<1x16x16xf32, #tpu.memory_space<vmem>>, vector<1x16x16xf32>
    %c0_2 = arith.constant 0 : index
    %c0_3 = arith.constant 0 : index
    %c0_4 = arith.constant 0 : index
    %1 = vector.load %arg2[%c0_2, %c0_3, %c0_4] : memref<1x16x16xf32, #tpu.memory_space<vmem>>, vector<1x16x16xf32>
    %c0_5 = arith.constant 0 : index
    %c0_6 = arith.constant 0 : index
    %c0_7 = arith.constant 0 : index
    %2 = vector.load %arg3[%c0_5, %c0_6, %c0_7] : memref<1x16x16xf32, #tpu.memory_space<vmem>>, vector<1x16x16xf32>
    %3 = arith.subf %0, %1 : vector<1x16x16xf32>
    %4 = tpu.iota {dimensions = array<i32: 1>} : vector<1x16x16xi32>
    %5 = tpu.iota {dimensions = array<i32: 2>} : vector<1x16x16xi32>
    %c15_i32 = arith.constant 15 : i32
    %6 = tpu.dynamic_rotate %5 by %c15_i32 dim 2 : vector<1x16x16xi32>, i32 -> vector<1x16x16xi32>
    %c1_i32 = arith.constant 1 : i32
    %7 = vector.broadcast %c1_i32 : i32 to vector<1x16x16xi32>
    %8 = arith.addi %5, %7 : vector<1x16x16xi32>
    %c16_i32 = arith.constant 16 : i32
    %9 = vector.broadcast %c16_i32 : i32 to vector<1x16x16xi32>
    %10 = arith.cmpi sge, %8, %9 : vector<1x16x16xi32>
    %c1_i32_8 = arith.constant 1 : i32
    %11 = vector.broadcast %c1_i32_8 : i32 to vector<1x16x16xi32>
    %12 = arith.addi %5, %11 : vector<1x16x16xi32>
    %c16_i32_9 = arith.constant 16 : i32
    %13 = vector.broadcast %c16_i32_9 : i32 to vector<1x16x16xi32>
    %14 = arith.subi %12, %13 : vector<1x16x16xi32>
    %c1_i32_10 = arith.constant 1 : i32
    %15 = vector.broadcast %c1_i32_10 : i32 to vector<1x16x16xi32>
    %16 = arith.addi %5, %15 : vector<1x16x16xi32>
    %17 = arith.select %10, %14, %16 : vector<1x16x16xi1>, vector<1x16x16xi32>
    %18 = arith.cmpi eq, %6, %17 : vector<1x16x16xi32>
    %c15_i32_11 = arith.constant 15 : i32
    %19 = tpu.dynamic_rotate %4 by %c15_i32_11 dim 1 : vector<1x16x16xi32>, i32 -> vector<1x16x16xi32>
    %c1_i32_12 = arith.constant 1 : i32
    %20 = vector.broadcast %c1_i32_12 : i32 to vector<1x16x16xi32>
    %21 = arith.addi %4, %20 : vector<1x16x16xi32>
    %c16_i32_13 = arith.constant 16 : i32
    %22 = vector.broadcast %c16_i32_13 : i32 to vector<1x16x16xi32>
    %23 = arith.cmpi sge, %21, %22 : vector<1x16x16xi32>
    %c1_i32_14 = arith.constant 1 : i32
    %24 = vector.broadcast %c1_i32_14 : i32 to vector<1x16x16xi32>
    %25 = arith.addi %4, %24 : vector<1x16x16xi32>
    %c16_i32_15 = arith.constant 16 : i32
    %26 = vector.broadcast %c16_i32_15 : i32 to vector<1x16x16xi32>
    %27 = arith.subi %25, %26 : vector<1x16x16xi32>
    %c1_i32_16 = arith.constant 1 : i32
    %28 = vector.broadcast %c1_i32_16 : i32 to vector<1x16x16xi32>
    %29 = arith.addi %4, %28 : vector<1x16x16xi32>
    %30 = arith.select %23, %27, %29 : vector<1x16x16xi1>, vector<1x16x16xi32>
    %31 = arith.cmpi eq, %19, %30 : vector<1x16x16xi32>
    %32 = arith.mulf %2, %3 : vector<1x16x16xf32>
    %c15_i32_17 = arith.constant 15 : i32
    %33 = tpu.dynamic_rotate %32 by %c15_i32_17 dim 2 : vector<1x16x16xf32>, i32 -> vector<1x16x16xf32>
    %c15_i32_18 = arith.constant 15 : i32
    %34 = tpu.dynamic_rotate %2 by %c15_i32_18 dim 2 : vector<1x16x16xf32>, i32 -> vector<1x16x16xf32>
    %c15_i32_19 = arith.constant 15 : i32
    %35 = vector.broadcast %c15_i32_19 : i32 to vector<1x16x16xi32>
    %36 = arith.cmpi slt, %5, %35 : vector<1x16x16xi32>
    %c1_i32_20 = arith.constant 1 : i32
    %37 = vector.broadcast %c1_i32_20 : i32 to vector<1x16x16xi32>
    %38 = arith.cmpi sge, %5, %37 : vector<1x16x16xi32>
    %39 = arith.select %18, %36, %38 : vector<1x16x16xi1>, vector<1x16x16xi1>
    %40 = arith.extui %39 : vector<1x16x16xi1> to vector<1x16x16xi32>
    %41 = arith.sitofp %40 : vector<1x16x16xi32> to vector<1x16x16xf32>
    %42 = arith.subf %33, %32 : vector<1x16x16xf32>
    %43 = math.absf %42 : vector<1x16x16xf32>
    %44 = arith.mulf %34, %2 : vector<1x16x16xf32>
    %45 = arith.mulf %43, %44 : vector<1x16x16xf32>
    %46 = arith.mulf %45, %41 : vector<1x16x16xf32>
    %c15_i32_21 = arith.constant 15 : i32
    %47 = tpu.dynamic_rotate %32 by %c15_i32_21 dim 1 : vector<1x16x16xf32>, i32 -> vector<1x16x16xf32>
    %c15_i32_22 = arith.constant 15 : i32
    %48 = tpu.dynamic_rotate %2 by %c15_i32_22 dim 1 : vector<1x16x16xf32>, i32 -> vector<1x16x16xf32>
    %c15_i32_23 = arith.constant 15 : i32
    %49 = vector.broadcast %c15_i32_23 : i32 to vector<1x16x16xi32>
    %50 = arith.cmpi slt, %4, %49 : vector<1x16x16xi32>
    %c1_i32_24 = arith.constant 1 : i32
    %51 = vector.broadcast %c1_i32_24 : i32 to vector<1x16x16xi32>
    %52 = arith.cmpi sge, %4, %51 : vector<1x16x16xi32>
    %53 = arith.select %31, %50, %52 : vector<1x16x16xi1>, vector<1x16x16xi1>
    %54 = arith.extui %53 : vector<1x16x16xi1> to vector<1x16x16xi32>
    %55 = arith.sitofp %54 : vector<1x16x16xi32> to vector<1x16x16xf32>
    %56 = arith.subf %47, %32 : vector<1x16x16xf32>
    %57 = math.absf %56 : vector<1x16x16xf32>
    %58 = arith.mulf %48, %2 : vector<1x16x16xf32>
    %59 = arith.mulf %57, %58 : vector<1x16x16xf32>
    %60 = arith.mulf %59, %55 : vector<1x16x16xf32>
    %61 = arith.addf %46, %60 : vector<1x16x16xf32>
    %62 = vector.shape_cast %61 : vector<1x16x16xf32> to vector<1x1x16x16xf32>
    %cst = arith.constant dense<0.000000e+00> : vector<1xf32>
    %63 = vector.multi_reduction <add>, %62, %cst [1, 2, 3] : vector<1x1x16x16xf32> to vector<1xf32>
    %64 = vector.shape_cast %63 : vector<1xf32> to vector<1x1x1x1xf32>
    %65 = vector.extract %64[0, 0, 0, 0] : f32 from vector<1x1x1x1xf32>
    %66 = vector.shape_cast %2 : vector<1x16x16xf32> to vector<1x1x16x16xf32>
    %cst_25 = arith.constant dense<0.000000e+00> : vector<1xf32>
    %67 = vector.multi_reduction <add>, %66, %cst_25 [1, 2, 3] : vector<1x1x16x16xf32> to vector<1xf32>
    %68 = vector.shape_cast %67 : vector<1xf32> to vector<1x1x1x1xf32>
    %69 = vector.extract %68[0, 0, 0, 0] : f32 from vector<1x1x1x1xf32>
    %c1_i32_26 = arith.constant 1 : i32
    %70 = vector.broadcast %c1_i32_26 : i32 to vector<1x16x16xi32>
    %71 = arith.andi %4, %70 : vector<1x16x16xi32>
    %c0_i32 = arith.constant 0 : i32
    %72 = vector.broadcast %c0_i32 : i32 to vector<1x16x16xi32>
    %73 = arith.cmpi eq, %71, %72 : vector<1x16x16xi32>
    %c1_i32_27 = arith.constant 1 : i32
    %74 = vector.broadcast %c1_i32_27 : i32 to vector<1x16x16xi32>
    %75 = arith.andi %5, %74 : vector<1x16x16xi32>
    %c0_i32_28 = arith.constant 0 : i32
    %76 = vector.broadcast %c0_i32_28 : i32 to vector<1x16x16xi32>
    %77 = arith.cmpi eq, %75, %76 : vector<1x16x16xi32>
    %78 = arith.andi %73, %77 : vector<1x16x16xi1>
    %79 = arith.extui %78 : vector<1x16x16xi1> to vector<1x16x16xi32>
    %80 = arith.sitofp %79 : vector<1x16x16xi32> to vector<1x16x16xf32>
    %81 = arith.mulf %2, %80 : vector<1x16x16xf32>
    %82 = arith.mulf %81, %3 : vector<1x16x16xf32>
    %c14_i32 = arith.constant 14 : i32
    %83 = tpu.dynamic_rotate %82 by %c14_i32 dim 2 : vector<1x16x16xf32>, i32 -> vector<1x16x16xf32>
    %c14_i32_29 = arith.constant 14 : i32
    %84 = tpu.dynamic_rotate %81 by %c14_i32_29 dim 2 : vector<1x16x16xf32>, i32 -> vector<1x16x16xf32>
    %c14_i32_30 = arith.constant 14 : i32
    %85 = vector.broadcast %c14_i32_30 : i32 to vector<1x16x16xi32>
    %86 = arith.cmpi slt, %5, %85 : vector<1x16x16xi32>
    %c2_i32 = arith.constant 2 : i32
    %87 = vector.broadcast %c2_i32 : i32 to vector<1x16x16xi32>
    %88 = arith.cmpi sge, %5, %87 : vector<1x16x16xi32>
    %89 = arith.select %18, %86, %88 : vector<1x16x16xi1>, vector<1x16x16xi1>
    %90 = arith.extui %89 : vector<1x16x16xi1> to vector<1x16x16xi32>
    %91 = arith.sitofp %90 : vector<1x16x16xi32> to vector<1x16x16xf32>
    %92 = arith.subf %83, %82 : vector<1x16x16xf32>
    %93 = math.absf %92 : vector<1x16x16xf32>
    %94 = arith.mulf %84, %81 : vector<1x16x16xf32>
    %95 = arith.mulf %93, %94 : vector<1x16x16xf32>
    %96 = arith.mulf %95, %91 : vector<1x16x16xf32>
    %c14_i32_31 = arith.constant 14 : i32
    %97 = tpu.dynamic_rotate %82 by %c14_i32_31 dim 1 : vector<1x16x16xf32>, i32 -> vector<1x16x16xf32>
    %c14_i32_32 = arith.constant 14 : i32
    %98 = tpu.dynamic_rotate %81 by %c14_i32_32 dim 1 : vector<1x16x16xf32>, i32 -> vector<1x16x16xf32>
    %c14_i32_33 = arith.constant 14 : i32
    %99 = vector.broadcast %c14_i32_33 : i32 to vector<1x16x16xi32>
    %100 = arith.cmpi slt, %4, %99 : vector<1x16x16xi32>
    %c2_i32_34 = arith.constant 2 : i32
    %101 = vector.broadcast %c2_i32_34 : i32 to vector<1x16x16xi32>
    %102 = arith.cmpi sge, %4, %101 : vector<1x16x16xi32>
    %103 = arith.select %31, %100, %102 : vector<1x16x16xi1>, vector<1x16x16xi1>
    %104 = arith.extui %103 : vector<1x16x16xi1> to vector<1x16x16xi32>
    %105 = arith.sitofp %104 : vector<1x16x16xi32> to vector<1x16x16xf32>
    %106 = arith.subf %97, %82 : vector<1x16x16xf32>
    %107 = math.absf %106 : vector<1x16x16xf32>
    %108 = arith.mulf %98, %81 : vector<1x16x16xf32>
    %109 = arith.mulf %107, %108 : vector<1x16x16xf32>
    %110 = arith.mulf %109, %105 : vector<1x16x16xf32>
    %111 = arith.addf %96, %110 : vector<1x16x16xf32>
    %112 = vector.shape_cast %111 : vector<1x16x16xf32> to vector<1x1x16x16xf32>
    %cst_35 = arith.constant dense<0.000000e+00> : vector<1xf32>
    %113 = vector.multi_reduction <add>, %112, %cst_35 [1, 2, 3] : vector<1x1x16x16xf32> to vector<1xf32>
    %114 = vector.shape_cast %113 : vector<1xf32> to vector<1x1x1x1xf32>
    %115 = vector.extract %114[0, 0, 0, 0] : f32 from vector<1x1x1x1xf32>
    %116 = vector.shape_cast %81 : vector<1x16x16xf32> to vector<1x1x16x16xf32>
    %cst_36 = arith.constant dense<0.000000e+00> : vector<1xf32>
    %117 = vector.multi_reduction <add>, %116, %cst_36 [1, 2, 3] : vector<1x1x16x16xf32> to vector<1xf32>
    %118 = vector.shape_cast %117 : vector<1xf32> to vector<1x1x1x1xf32>
    %119 = vector.extract %118[0, 0, 0, 0] : f32 from vector<1x1x1x1xf32>
    %c3_i32 = arith.constant 3 : i32
    %120 = vector.broadcast %c3_i32 : i32 to vector<1x16x16xi32>
    %121 = arith.andi %4, %120 : vector<1x16x16xi32>
    %c0_i32_37 = arith.constant 0 : i32
    %122 = vector.broadcast %c0_i32_37 : i32 to vector<1x16x16xi32>
    %123 = arith.cmpi eq, %121, %122 : vector<1x16x16xi32>
    %c3_i32_38 = arith.constant 3 : i32
    %124 = vector.broadcast %c3_i32_38 : i32 to vector<1x16x16xi32>
    %125 = arith.andi %5, %124 : vector<1x16x16xi32>
    %c0_i32_39 = arith.constant 0 : i32
    %126 = vector.broadcast %c0_i32_39 : i32 to vector<1x16x16xi32>
    %127 = arith.cmpi eq, %125, %126 : vector<1x16x16xi32>
    %128 = arith.andi %123, %127 : vector<1x16x16xi1>
    %129 = arith.extui %128 : vector<1x16x16xi1> to vector<1x16x16xi32>
    %130 = arith.sitofp %129 : vector<1x16x16xi32> to vector<1x16x16xf32>
    %131 = arith.mulf %2, %130 : vector<1x16x16xf32>
    %132 = arith.mulf %131, %3 : vector<1x16x16xf32>
    %c12_i32 = arith.constant 12 : i32
    %133 = tpu.dynamic_rotate %132 by %c12_i32 dim 2 : vector<1x16x16xf32>, i32 -> vector<1x16x16xf32>
    %c12_i32_40 = arith.constant 12 : i32
    %134 = tpu.dynamic_rotate %131 by %c12_i32_40 dim 2 : vector<1x16x16xf32>, i32 -> vector<1x16x16xf32>
    %c12_i32_41 = arith.constant 12 : i32
    %135 = vector.broadcast %c12_i32_41 : i32 to vector<1x16x16xi32>
    %136 = arith.cmpi slt, %5, %135 : vector<1x16x16xi32>
    %c4_i32 = arith.constant 4 : i32
    %137 = vector.broadcast %c4_i32 : i32 to vector<1x16x16xi32>
    %138 = arith.cmpi sge, %5, %137 : vector<1x16x16xi32>
    %139 = arith.select %18, %136, %138 : vector<1x16x16xi1>, vector<1x16x16xi1>
    %140 = arith.extui %139 : vector<1x16x16xi1> to vector<1x16x16xi32>
    %141 = arith.sitofp %140 : vector<1x16x16xi32> to vector<1x16x16xf32>
    %142 = arith.subf %133, %132 : vector<1x16x16xf32>
    %143 = math.absf %142 : vector<1x16x16xf32>
    %144 = arith.mulf %134, %131 : vector<1x16x16xf32>
    %145 = arith.mulf %143, %144 : vector<1x16x16xf32>
    %146 = arith.mulf %145, %141 : vector<1x16x16xf32>
    %c12_i32_42 = arith.constant 12 : i32
    %147 = tpu.dynamic_rotate %132 by %c12_i32_42 dim 1 : vector<1x16x16xf32>, i32 -> vector<1x16x16xf32>
    %c12_i32_43 = arith.constant 12 : i32
    %148 = tpu.dynamic_rotate %131 by %c12_i32_43 dim 1 : vector<1x16x16xf32>, i32 -> vector<1x16x16xf32>
    %c12_i32_44 = arith.constant 12 : i32
    %149 = vector.broadcast %c12_i32_44 : i32 to vector<1x16x16xi32>
    %150 = arith.cmpi slt, %4, %149 : vector<1x16x16xi32>
    %c4_i32_45 = arith.constant 4 : i32
    %151 = vector.broadcast %c4_i32_45 : i32 to vector<1x16x16xi32>
    %152 = arith.cmpi sge, %4, %151 : vector<1x16x16xi32>
    %153 = arith.select %31, %150, %152 : vector<1x16x16xi1>, vector<1x16x16xi1>
    %154 = arith.extui %153 : vector<1x16x16xi1> to vector<1x16x16xi32>
    %155 = arith.sitofp %154 : vector<1x16x16xi32> to vector<1x16x16xf32>
    %156 = arith.subf %147, %132 : vector<1x16x16xf32>
    %157 = math.absf %156 : vector<1x16x16xf32>
    %158 = arith.mulf %148, %131 : vector<1x16x16xf32>
    %159 = arith.mulf %157, %158 : vector<1x16x16xf32>
    %160 = arith.mulf %159, %155 : vector<1x16x16xf32>
    %161 = arith.addf %146, %160 : vector<1x16x16xf32>
    %162 = vector.shape_cast %161 : vector<1x16x16xf32> to vector<1x1x16x16xf32>
    %cst_46 = arith.constant dense<0.000000e+00> : vector<1xf32>
    %163 = vector.multi_reduction <add>, %162, %cst_46 [1, 2, 3] : vector<1x1x16x16xf32> to vector<1xf32>
    %164 = vector.shape_cast %163 : vector<1xf32> to vector<1x1x1x1xf32>
    %165 = vector.extract %164[0, 0, 0, 0] : f32 from vector<1x1x1x1xf32>
    %166 = vector.shape_cast %131 : vector<1x16x16xf32> to vector<1x1x16x16xf32>
    %cst_47 = arith.constant dense<0.000000e+00> : vector<1xf32>
    %167 = vector.multi_reduction <add>, %166, %cst_47 [1, 2, 3] : vector<1x1x16x16xf32> to vector<1xf32>
    %168 = vector.shape_cast %167 : vector<1xf32> to vector<1x1x1x1xf32>
    %169 = vector.extract %168[0, 0, 0, 0] : f32 from vector<1x1x1x1xf32>
    %c7_i32 = arith.constant 7 : i32
    %170 = vector.broadcast %c7_i32 : i32 to vector<1x16x16xi32>
    %171 = arith.andi %4, %170 : vector<1x16x16xi32>
    %c0_i32_48 = arith.constant 0 : i32
    %172 = vector.broadcast %c0_i32_48 : i32 to vector<1x16x16xi32>
    %173 = arith.cmpi eq, %171, %172 : vector<1x16x16xi32>
    %c7_i32_49 = arith.constant 7 : i32
    %174 = vector.broadcast %c7_i32_49 : i32 to vector<1x16x16xi32>
    %175 = arith.andi %5, %174 : vector<1x16x16xi32>
    %c0_i32_50 = arith.constant 0 : i32
    %176 = vector.broadcast %c0_i32_50 : i32 to vector<1x16x16xi32>
    %177 = arith.cmpi eq, %175, %176 : vector<1x16x16xi32>
    %178 = arith.andi %173, %177 : vector<1x16x16xi1>
    %179 = arith.extui %178 : vector<1x16x16xi1> to vector<1x16x16xi32>
    %180 = arith.sitofp %179 : vector<1x16x16xi32> to vector<1x16x16xf32>
    %181 = arith.mulf %2, %180 : vector<1x16x16xf32>
    %182 = arith.mulf %181, %3 : vector<1x16x16xf32>
    %c8_i32 = arith.constant 8 : i32
    %183 = tpu.dynamic_rotate %182 by %c8_i32 dim 2 : vector<1x16x16xf32>, i32 -> vector<1x16x16xf32>
    %c8_i32_51 = arith.constant 8 : i32
    %184 = tpu.dynamic_rotate %181 by %c8_i32_51 dim 2 : vector<1x16x16xf32>, i32 -> vector<1x16x16xf32>
    %c8_i32_52 = arith.constant 8 : i32
    %185 = vector.broadcast %c8_i32_52 : i32 to vector<1x16x16xi32>
    %186 = arith.cmpi slt, %5, %185 : vector<1x16x16xi32>
    %c8_i32_53 = arith.constant 8 : i32
    %187 = vector.broadcast %c8_i32_53 : i32 to vector<1x16x16xi32>
    %188 = arith.cmpi sge, %5, %187 : vector<1x16x16xi32>
    %189 = arith.select %18, %186, %188 : vector<1x16x16xi1>, vector<1x16x16xi1>
    %190 = arith.extui %189 : vector<1x16x16xi1> to vector<1x16x16xi32>
    %191 = arith.sitofp %190 : vector<1x16x16xi32> to vector<1x16x16xf32>
    %192 = arith.subf %183, %182 : vector<1x16x16xf32>
    %193 = math.absf %192 : vector<1x16x16xf32>
    %194 = arith.mulf %184, %181 : vector<1x16x16xf32>
    %195 = arith.mulf %193, %194 : vector<1x16x16xf32>
    %196 = arith.mulf %195, %191 : vector<1x16x16xf32>
    %c8_i32_54 = arith.constant 8 : i32
    %197 = tpu.dynamic_rotate %182 by %c8_i32_54 dim 1 : vector<1x16x16xf32>, i32 -> vector<1x16x16xf32>
    %c8_i32_55 = arith.constant 8 : i32
    %198 = tpu.dynamic_rotate %181 by %c8_i32_55 dim 1 : vector<1x16x16xf32>, i32 -> vector<1x16x16xf32>
    %c8_i32_56 = arith.constant 8 : i32
    %199 = vector.broadcast %c8_i32_56 : i32 to vector<1x16x16xi32>
    %200 = arith.cmpi slt, %4, %199 : vector<1x16x16xi32>
    %c8_i32_57 = arith.constant 8 : i32
    %201 = vector.broadcast %c8_i32_57 : i32 to vector<1x16x16xi32>
    %202 = arith.cmpi sge, %4, %201 : vector<1x16x16xi32>
    %203 = arith.select %31, %200, %202 : vector<1x16x16xi1>, vector<1x16x16xi1>
    %204 = arith.extui %203 : vector<1x16x16xi1> to vector<1x16x16xi32>
    %205 = arith.sitofp %204 : vector<1x16x16xi32> to vector<1x16x16xf32>
    %206 = arith.subf %197, %182 : vector<1x16x16xf32>
    %207 = math.absf %206 : vector<1x16x16xf32>
    %208 = arith.mulf %198, %181 : vector<1x16x16xf32>
    %209 = arith.mulf %207, %208 : vector<1x16x16xf32>
    %210 = arith.mulf %209, %205 : vector<1x16x16xf32>
    %211 = arith.addf %196, %210 : vector<1x16x16xf32>
    %212 = vector.shape_cast %211 : vector<1x16x16xf32> to vector<1x1x16x16xf32>
    %cst_58 = arith.constant dense<0.000000e+00> : vector<1xf32>
    %213 = vector.multi_reduction <add>, %212, %cst_58 [1, 2, 3] : vector<1x1x16x16xf32> to vector<1xf32>
    %214 = vector.shape_cast %213 : vector<1xf32> to vector<1x1x1x1xf32>
    %215 = vector.extract %214[0, 0, 0, 0] : f32 from vector<1x1x1x1xf32>
    %216 = vector.shape_cast %181 : vector<1x16x16xf32> to vector<1x1x16x16xf32>
    %cst_59 = arith.constant dense<0.000000e+00> : vector<1xf32>
    %217 = vector.multi_reduction <add>, %216, %cst_59 [1, 2, 3] : vector<1x1x16x16xf32> to vector<1xf32>
    %218 = vector.shape_cast %217 : vector<1xf32> to vector<1x1x1x1xf32>
    %219 = vector.extract %218[0, 0, 0, 0] : f32 from vector<1x1x1x1xf32>
    %220 = tpu.iota {dimensions = array<i32: 1>} : vector<8x128xi32>
    %221 = tpu.iota {dimensions = array<i32: 0>} : vector<8x128xi32>
    %cst_60 = arith.constant 0.000000e+00 : f32
    %222 = vector.broadcast %cst_60 : f32 to vector<8x128xf32>
    %c0_i32_61 = arith.constant 0 : i32
    %223 = vector.broadcast %c0_i32_61 : i32 to vector<8x128xi32>
    %224 = arith.cmpi eq, %221, %223 : vector<8x128xi32>
    %c0_i32_62 = arith.constant 0 : i32
    %225 = vector.broadcast %c0_i32_62 : i32 to vector<8x128xi32>
    %226 = arith.cmpi eq, %220, %225 : vector<8x128xi32>
    %227 = arith.andi %224, %226 : vector<8x128xi1>
    %228 = vector.broadcast %65 : f32 to vector<8x128xf32>
    %229 = arith.select %227, %228, %222 : vector<8x128xi1>, vector<8x128xf32>
    %c1_i32_63 = arith.constant 1 : i32
    %230 = vector.broadcast %c1_i32_63 : i32 to vector<8x128xi32>
    %231 = arith.cmpi eq, %221, %230 : vector<8x128xi32>
    %c0_i32_64 = arith.constant 0 : i32
    %232 = vector.broadcast %c0_i32_64 : i32 to vector<8x128xi32>
    %233 = arith.cmpi eq, %220, %232 : vector<8x128xi32>
    %234 = arith.andi %231, %233 : vector<8x128xi1>
    %235 = vector.broadcast %69 : f32 to vector<8x128xf32>
    %236 = arith.select %234, %235, %229 : vector<8x128xi1>, vector<8x128xf32>
    %c0_i32_65 = arith.constant 0 : i32
    %237 = vector.broadcast %c0_i32_65 : i32 to vector<8x128xi32>
    %238 = arith.cmpi eq, %221, %237 : vector<8x128xi32>
    %c1_i32_66 = arith.constant 1 : i32
    %239 = vector.broadcast %c1_i32_66 : i32 to vector<8x128xi32>
    %240 = arith.cmpi eq, %220, %239 : vector<8x128xi32>
    %241 = arith.andi %238, %240 : vector<8x128xi1>
    %242 = vector.broadcast %115 : f32 to vector<8x128xf32>
    %243 = arith.select %241, %242, %236 : vector<8x128xi1>, vector<8x128xf32>
    %c1_i32_67 = arith.constant 1 : i32
    %244 = vector.broadcast %c1_i32_67 : i32 to vector<8x128xi32>
    %245 = arith.cmpi eq, %221, %244 : vector<8x128xi32>
    %c1_i32_68 = arith.constant 1 : i32
    %246 = vector.broadcast %c1_i32_68 : i32 to vector<8x128xi32>
    %247 = arith.cmpi eq, %220, %246 : vector<8x128xi32>
    %248 = arith.andi %245, %247 : vector<8x128xi1>
    %249 = vector.broadcast %119 : f32 to vector<8x128xf32>
    %250 = arith.select %248, %249, %243 : vector<8x128xi1>, vector<8x128xf32>
    %c0_i32_69 = arith.constant 0 : i32
    %251 = vector.broadcast %c0_i32_69 : i32 to vector<8x128xi32>
    %252 = arith.cmpi eq, %221, %251 : vector<8x128xi32>
    %c2_i32_70 = arith.constant 2 : i32
    %253 = vector.broadcast %c2_i32_70 : i32 to vector<8x128xi32>
    %254 = arith.cmpi eq, %220, %253 : vector<8x128xi32>
    %255 = arith.andi %252, %254 : vector<8x128xi1>
    %256 = vector.broadcast %165 : f32 to vector<8x128xf32>
    %257 = arith.select %255, %256, %250 : vector<8x128xi1>, vector<8x128xf32>
    %c1_i32_71 = arith.constant 1 : i32
    %258 = vector.broadcast %c1_i32_71 : i32 to vector<8x128xi32>
    %259 = arith.cmpi eq, %221, %258 : vector<8x128xi32>
    %c2_i32_72 = arith.constant 2 : i32
    %260 = vector.broadcast %c2_i32_72 : i32 to vector<8x128xi32>
    %261 = arith.cmpi eq, %220, %260 : vector<8x128xi32>
    %262 = arith.andi %259, %261 : vector<8x128xi1>
    %263 = vector.broadcast %169 : f32 to vector<8x128xf32>
    %264 = arith.select %262, %263, %257 : vector<8x128xi1>, vector<8x128xf32>
    %c0_i32_73 = arith.constant 0 : i32
    %265 = vector.broadcast %c0_i32_73 : i32 to vector<8x128xi32>
    %266 = arith.cmpi eq, %221, %265 : vector<8x128xi32>
    %c3_i32_74 = arith.constant 3 : i32
    %267 = vector.broadcast %c3_i32_74 : i32 to vector<8x128xi32>
    %268 = arith.cmpi eq, %220, %267 : vector<8x128xi32>
    %269 = arith.andi %266, %268 : vector<8x128xi1>
    %270 = vector.broadcast %215 : f32 to vector<8x128xf32>
    %271 = arith.select %269, %270, %264 : vector<8x128xi1>, vector<8x128xf32>
    %c1_i32_75 = arith.constant 1 : i32
    %272 = vector.broadcast %c1_i32_75 : i32 to vector<8x128xi32>
    %273 = arith.cmpi eq, %221, %272 : vector<8x128xi32>
    %c3_i32_76 = arith.constant 3 : i32
    %274 = vector.broadcast %c3_i32_76 : i32 to vector<8x128xi32>
    %275 = arith.cmpi eq, %220, %274 : vector<8x128xi32>
    %276 = arith.andi %273, %275 : vector<8x128xi1>
    %277 = vector.broadcast %219 : f32 to vector<8x128xf32>
    %278 = arith.select %276, %277, %271 : vector<8x128xi1>, vector<8x128xf32>
    %c0_77 = arith.constant 0 : index
    %c0_78 = arith.constant 0 : index
    %c0_79 = arith.constant 0 : index
    %279 = vector.load %arg4[%c0_77, %c0_78, %c0_79] : memref<1x8x128xf32, #tpu.memory_space<vmem>>, vector<1x8x128xf32>
    %280 = vector.shape_cast %279 : vector<1x8x128xf32> to vector<8x128xf32>
    %281 = vector.shape_cast %278 : vector<8x128xf32> to vector<1x8x128xf32>
    tpu.vector_store %arg4[%c0_77, %c0_78, %c0_79], %281 {strides = array<i32>} : memref<1x8x128xf32, #tpu.memory_space<vmem>>, vector<1x8x128xf32>,
    return
  }
  func.func @transform_0(%arg0: i32) -> (i32, i32, i32) {
    %c0_i32 = arith.constant 0 : i32
    %c0_i32_0 = arith.constant 0 : i32
    %c0_i32_1 = arith.constant 0 : i32
    return %arg0, %c0_i32, %c0_i32_0 : i32, i32, i32
  }
  func.func @transform_1(%arg0: i32) -> (i32, i32, i32) {
    %c0_i32 = arith.constant 0 : i32
    %c0_i32_0 = arith.constant 0 : i32
    %c0_i32_1 = arith.constant 0 : i32
    return %arg0, %c0_i32, %c0_i32_0 : i32, i32, i32
  }
  func.func @transform_2(%arg0: i32) -> (i32, i32, i32) {
    %c0_i32 = arith.constant 0 : i32
    %c0_i32_0 = arith.constant 0 : i32
    %c0_i32_1 = arith.constant 0 : i32
    return %arg0, %c0_i32, %c0_i32_0 : i32, i32, i32
  }
  func.func @transform_3(%arg0: i32) -> (i32, i32, i32) {
    %c0_i32 = arith.constant 0 : i32
    %c0_i32_0 = arith.constant 0 : i32
    %c0_i32_1 = arith.constant 0 : i32
    return %arg0, %c0_i32, %c0_i32_0 : i32, i32, i32
  }
}

module attributes {stable_mosaic.version = 11 : i64} {
  func.func @_fused_gradient_loss_kernel(%arg0: i32, %arg1: memref<1x16x16xf32, #tpu.memory_space<vmem>>, %arg2: memref<1x16x16xf32, #tpu.memory_space<vmem>>, %arg3: memref<1x16x16xf32, #tpu.memory_space<vmem>>, %arg4: memref<1x8x128xf32, #tpu.memory_space<vmem>>) attributes {dimension_semantics = [#tpu.dimension_semantics<parallel>], iteration_bounds = array<i64: 2>, scalar_prefetch = 0 : i64, scratch_operands = 0 : i64, tpu.core_type = #tpu.core_type<tc>, window_params = [{transform_indices = @transform_0, window_bounds = array<i64: 1, 16, 16>}, {transform_indices = @transform_1, window_bounds = array<i64: 1, 16, 16>}, {transform_indices = @transform_2, window_bounds = array<i64: 1, 16, 16>}, {transform_indices = @transform_3, window_bounds = array<i64: 1, 8, 128>}]} {
    %c0 = arith.constant 0 : index
    %c0_0 = arith.constant 0 : index
    %c0_1 = arith.constant 0 : index
    %0 = vector.load %arg1[%c0, %c0_0, %c0_1] : memref<1x16x16xf32, #tpu.memory_space<vmem>>, vector<1x16x16xf32>
    %c0_2 = arith.constant 0 : index
    %c0_3 = arith.constant 0 : index
    %c0_4 = arith.constant 0 : index
    %1 = vector.load %arg2[%c0_2, %c0_3, %c0_4] : memref<1x16x16xf32, #tpu.memory_space<vmem>>, vector<1x16x16xf32>
    %c0_5 = arith.constant 0 : index
    %c0_6 = arith.constant 0 : index
    %c0_7 = arith.constant 0 : index
    %2 = vector.load %arg3[%c0_5, %c0_6, %c0_7] : memref<1x16x16xf32, #tpu.memory_space<vmem>>, vector<1x16x16xf32>
    %3 = arith.subf %0, %1 : vector<1x16x16xf32>
    %4 = tpu.iota {dimensions = array<i32: 1>} : vector<1x16x16xi32>
    %5 = tpu.iota {dimensions = array<i32: 2>} : vector<1x16x16xi32>
    %6 = arith.mulf %2, %3 : vector<1x16x16xf32>
    %7 = vector.extract_strided_slice %6 {offsets = [0, 0, 1], sizes = [1, 16, 15], strides = [1, 1, 1]} : vector<1x16x16xf32> to vector<1x16x15xf32>
    %8 = vector.extract_strided_slice %6 {offsets = [0, 0, 0], sizes = [1, 16, 15], strides = [1, 1, 1]} : vector<1x16x16xf32> to vector<1x16x15xf32>
    %9 = arith.subf %7, %8 : vector<1x16x15xf32>
    %10 = math.absf %9 : vector<1x16x15xf32>
    %11 = vector.extract_strided_slice %2 {offsets = [0, 0, 1], sizes = [1, 16, 15], strides = [1, 1, 1]} : vector<1x16x16xf32> to vector<1x16x15xf32>
    %12 = vector.extract_strided_slice %2 {offsets = [0, 0, 0], sizes = [1, 16, 15], strides = [1, 1, 1]} : vector<1x16x16xf32> to vector<1x16x15xf32>
    %13 = arith.mulf %11, %12 : vector<1x16x15xf32>
    %14 = arith.mulf %10, %13 : vector<1x16x15xf32>
    %15 = vector.shape_cast %14 : vector<1x16x15xf32> to vector<1x1x16x15xf32>
    %cst = arith.constant dense<0.000000e+00> : vector<1xf32>
    %16 = vector.multi_reduction <add>, %15, %cst [1, 2, 3] : vector<1x1x16x15xf32> to vector<1xf32>
    %17 = vector.shape_cast %16 : vector<1xf32> to vector<1x1x1x1xf32>
    %18 = vector.extract %17[0, 0, 0, 0] : f32 from vector<1x1x1x1xf32>
    %cst_8 = arith.constant 0.000000e+00 : f32
    %19 = arith.addf %cst_8, %18 : f32
    %20 = vector.extract_strided_slice %6 {offsets = [0, 1, 0], sizes = [1, 15, 16], strides = [1, 1, 1]} : vector<1x16x16xf32> to vector<1x15x16xf32>
    %21 = vector.extract_strided_slice %6 {offsets = [0, 0, 0], sizes = [1, 15, 16], strides = [1, 1, 1]} : vector<1x16x16xf32> to vector<1x15x16xf32>
    %22 = arith.subf %20, %21 : vector<1x15x16xf32>
    %23 = math.absf %22 : vector<1x15x16xf32>
    %24 = vector.extract_strided_slice %2 {offsets = [0, 1, 0], sizes = [1, 15, 16], strides = [1, 1, 1]} : vector<1x16x16xf32> to vector<1x15x16xf32>
    %25 = vector.extract_strided_slice %2 {offsets = [0, 0, 0], sizes = [1, 15, 16], strides = [1, 1, 1]} : vector<1x16x16xf32> to vector<1x15x16xf32>
    %26 = arith.mulf %24, %25 : vector<1x15x16xf32>
    %27 = arith.mulf %23, %26 : vector<1x15x16xf32>
    %28 = vector.shape_cast %27 : vector<1x15x16xf32> to vector<1x1x15x16xf32>
    %cst_9 = arith.constant dense<0.000000e+00> : vector<1xf32>
    %29 = vector.multi_reduction <add>, %28, %cst_9 [1, 2, 3] : vector<1x1x15x16xf32> to vector<1xf32>
    %30 = vector.shape_cast %29 : vector<1xf32> to vector<1x1x1x1xf32>
    %31 = vector.extract %30[0, 0, 0, 0] : f32 from vector<1x1x1x1xf32>
    %32 = arith.addf %19, %31 : f32
    %33 = vector.shape_cast %2 : vector<1x16x16xf32> to vector<1x1x16x16xf32>
    %cst_10 = arith.constant dense<0.000000e+00> : vector<1xf32>
    %34 = vector.multi_reduction <add>, %33, %cst_10 [1, 2, 3] : vector<1x1x16x16xf32> to vector<1xf32>
    %35 = vector.shape_cast %34 : vector<1xf32> to vector<1x1x1x1xf32>
    %36 = vector.extract %35[0, 0, 0, 0] : f32 from vector<1x1x1x1xf32>
    %c1_i32 = arith.constant 1 : i32
    %37 = vector.broadcast %c1_i32 : i32 to vector<1x16x16xi32>
    %38 = arith.andi %4, %37 : vector<1x16x16xi32>
    %c0_i32 = arith.constant 0 : i32
    %39 = vector.broadcast %c0_i32 : i32 to vector<1x16x16xi32>
    %40 = arith.cmpi eq, %38, %39 : vector<1x16x16xi32>
    %c1_i32_11 = arith.constant 1 : i32
    %41 = vector.broadcast %c1_i32_11 : i32 to vector<1x16x16xi32>
    %42 = arith.andi %5, %41 : vector<1x16x16xi32>
    %c0_i32_12 = arith.constant 0 : i32
    %43 = vector.broadcast %c0_i32_12 : i32 to vector<1x16x16xi32>
    %44 = arith.cmpi eq, %42, %43 : vector<1x16x16xi32>
    %45 = arith.andi %40, %44 : vector<1x16x16xi1>
    %46 = arith.extui %45 : vector<1x16x16xi1> to vector<1x16x16xi32>
    %47 = arith.sitofp %46 : vector<1x16x16xi32> to vector<1x16x16xf32>
    %48 = arith.mulf %2, %47 : vector<1x16x16xf32>
    %49 = arith.mulf %48, %3 : vector<1x16x16xf32>
    %50 = vector.extract_strided_slice %49 {offsets = [0, 0, 2], sizes = [1, 16, 14], strides = [1, 1, 1]} : vector<1x16x16xf32> to vector<1x16x14xf32>
    %51 = vector.extract_strided_slice %49 {offsets = [0, 0, 0], sizes = [1, 16, 14], strides = [1, 1, 1]} : vector<1x16x16xf32> to vector<1x16x14xf32>
    %52 = arith.subf %50, %51 : vector<1x16x14xf32>
    %53 = math.absf %52 : vector<1x16x14xf32>
    %54 = vector.extract_strided_slice %48 {offsets = [0, 0, 2], sizes = [1, 16, 14], strides = [1, 1, 1]} : vector<1x16x16xf32> to vector<1x16x14xf32>
    %55 = vector.extract_strided_slice %48 {offsets = [0, 0, 0], sizes = [1, 16, 14], strides = [1, 1, 1]} : vector<1x16x16xf32> to vector<1x16x14xf32>
    %56 = arith.mulf %54, %55 : vector<1x16x14xf32>
    %57 = arith.mulf %53, %56 : vector<1x16x14xf32>
    %58 = vector.shape_cast %57 : vector<1x16x14xf32> to vector<1x1x16x14xf32>
    %cst_13 = arith.constant dense<0.000000e+00> : vector<1xf32>
    %59 = vector.multi_reduction <add>, %58, %cst_13 [1, 2, 3] : vector<1x1x16x14xf32> to vector<1xf32>
    %60 = vector.shape_cast %59 : vector<1xf32> to vector<1x1x1x1xf32>
    %61 = vector.extract %60[0, 0, 0, 0] : f32 from vector<1x1x1x1xf32>
    %cst_14 = arith.constant 0.000000e+00 : f32
    %62 = arith.addf %cst_14, %61 : f32
    %63 = vector.extract_strided_slice %49 {offsets = [0, 2, 0], sizes = [1, 14, 16], strides = [1, 1, 1]} : vector<1x16x16xf32> to vector<1x14x16xf32>
    %64 = vector.extract_strided_slice %49 {offsets = [0, 0, 0], sizes = [1, 14, 16], strides = [1, 1, 1]} : vector<1x16x16xf32> to vector<1x14x16xf32>
    %65 = arith.subf %63, %64 : vector<1x14x16xf32>
    %66 = math.absf %65 : vector<1x14x16xf32>
    %67 = vector.extract_strided_slice %48 {offsets = [0, 2, 0], sizes = [1, 14, 16], strides = [1, 1, 1]} : vector<1x16x16xf32> to vector<1x14x16xf32>
    %68 = vector.extract_strided_slice %48 {offsets = [0, 0, 0], sizes = [1, 14, 16], strides = [1, 1, 1]} : vector<1x16x16xf32> to vector<1x14x16xf32>
    %69 = arith.mulf %67, %68 : vector<1x14x16xf32>
    %70 = arith.mulf %66, %69 : vector<1x14x16xf32>
    %71 = vector.shape_cast %70 : vector<1x14x16xf32> to vector<1x1x14x16xf32>
    %cst_15 = arith.constant dense<0.000000e+00> : vector<1xf32>
    %72 = vector.multi_reduction <add>, %71, %cst_15 [1, 2, 3] : vector<1x1x14x16xf32> to vector<1xf32>
    %73 = vector.shape_cast %72 : vector<1xf32> to vector<1x1x1x1xf32>
    %74 = vector.extract %73[0, 0, 0, 0] : f32 from vector<1x1x1x1xf32>
    %75 = arith.addf %62, %74 : f32
    %76 = vector.shape_cast %48 : vector<1x16x16xf32> to vector<1x1x16x16xf32>
    %cst_16 = arith.constant dense<0.000000e+00> : vector<1xf32>
    %77 = vector.multi_reduction <add>, %76, %cst_16 [1, 2, 3] : vector<1x1x16x16xf32> to vector<1xf32>
    %78 = vector.shape_cast %77 : vector<1xf32> to vector<1x1x1x1xf32>
    %79 = vector.extract %78[0, 0, 0, 0] : f32 from vector<1x1x1x1xf32>
    %c3_i32 = arith.constant 3 : i32
    %80 = vector.broadcast %c3_i32 : i32 to vector<1x16x16xi32>
    %81 = arith.andi %4, %80 : vector<1x16x16xi32>
    %c0_i32_17 = arith.constant 0 : i32
    %82 = vector.broadcast %c0_i32_17 : i32 to vector<1x16x16xi32>
    %83 = arith.cmpi eq, %81, %82 : vector<1x16x16xi32>
    %c3_i32_18 = arith.constant 3 : i32
    %84 = vector.broadcast %c3_i32_18 : i32 to vector<1x16x16xi32>
    %85 = arith.andi %5, %84 : vector<1x16x16xi32>
    %c0_i32_19 = arith.constant 0 : i32
    %86 = vector.broadcast %c0_i32_19 : i32 to vector<1x16x16xi32>
    %87 = arith.cmpi eq, %85, %86 : vector<1x16x16xi32>
    %88 = arith.andi %83, %87 : vector<1x16x16xi1>
    %89 = arith.extui %88 : vector<1x16x16xi1> to vector<1x16x16xi32>
    %90 = arith.sitofp %89 : vector<1x16x16xi32> to vector<1x16x16xf32>
    %91 = arith.mulf %2, %90 : vector<1x16x16xf32>
    %92 = arith.mulf %91, %3 : vector<1x16x16xf32>
    %93 = vector.extract_strided_slice %92 {offsets = [0, 0, 4], sizes = [1, 16, 12], strides = [1, 1, 1]} : vector<1x16x16xf32> to vector<1x16x12xf32>
    %94 = vector.extract_strided_slice %92 {offsets = [0, 0, 0], sizes = [1, 16, 12], strides = [1, 1, 1]} : vector<1x16x16xf32> to vector<1x16x12xf32>
    %95 = arith.subf %93, %94 : vector<1x16x12xf32>
    %96 = math.absf %95 : vector<1x16x12xf32>
    %97 = vector.extract_strided_slice %91 {offsets = [0, 0, 4], sizes = [1, 16, 12], strides = [1, 1, 1]} : vector<1x16x16xf32> to vector<1x16x12xf32>
    %98 = vector.extract_strided_slice %91 {offsets = [0, 0, 0], sizes = [1, 16, 12], strides = [1, 1, 1]} : vector<1x16x16xf32> to vector<1x16x12xf32>
    %99 = arith.mulf %97, %98 : vector<1x16x12xf32>
    %100 = arith.mulf %96, %99 : vector<1x16x12xf32>
    %101 = vector.shape_cast %100 : vector<1x16x12xf32> to vector<1x1x16x12xf32>
    %cst_20 = arith.constant dense<0.000000e+00> : vector<1xf32>
    %102 = vector.multi_reduction <add>, %101, %cst_20 [1, 2, 3] : vector<1x1x16x12xf32> to vector<1xf32>
    %103 = vector.shape_cast %102 : vector<1xf32> to vector<1x1x1x1xf32>
    %104 = vector.extract %103[0, 0, 0, 0] : f32 from vector<1x1x1x1xf32>
    %cst_21 = arith.constant 0.000000e+00 : f32
    %105 = arith.addf %cst_21, %104 : f32
    %106 = vector.extract_strided_slice %92 {offsets = [0, 4, 0], sizes = [1, 12, 16], strides = [1, 1, 1]} : vector<1x16x16xf32> to vector<1x12x16xf32>
    %107 = vector.extract_strided_slice %92 {offsets = [0, 0, 0], sizes = [1, 12, 16], strides = [1, 1, 1]} : vector<1x16x16xf32> to vector<1x12x16xf32>
    %108 = arith.subf %106, %107 : vector<1x12x16xf32>
    %109 = math.absf %108 : vector<1x12x16xf32>
    %110 = vector.extract_strided_slice %91 {offsets = [0, 4, 0], sizes = [1, 12, 16], strides = [1, 1, 1]} : vector<1x16x16xf32> to vector<1x12x16xf32>
    %111 = vector.extract_strided_slice %91 {offsets = [0, 0, 0], sizes = [1, 12, 16], strides = [1, 1, 1]} : vector<1x16x16xf32> to vector<1x12x16xf32>
    %112 = arith.mulf %110, %111 : vector<1x12x16xf32>
    %113 = arith.mulf %109, %112 : vector<1x12x16xf32>
    %114 = vector.shape_cast %113 : vector<1x12x16xf32> to vector<1x1x12x16xf32>
    %cst_22 = arith.constant dense<0.000000e+00> : vector<1xf32>
    %115 = vector.multi_reduction <add>, %114, %cst_22 [1, 2, 3] : vector<1x1x12x16xf32> to vector<1xf32>
    %116 = vector.shape_cast %115 : vector<1xf32> to vector<1x1x1x1xf32>
    %117 = vector.extract %116[0, 0, 0, 0] : f32 from vector<1x1x1x1xf32>
    %118 = arith.addf %105, %117 : f32
    %119 = vector.shape_cast %91 : vector<1x16x16xf32> to vector<1x1x16x16xf32>
    %cst_23 = arith.constant dense<0.000000e+00> : vector<1xf32>
    %120 = vector.multi_reduction <add>, %119, %cst_23 [1, 2, 3] : vector<1x1x16x16xf32> to vector<1xf32>
    %121 = vector.shape_cast %120 : vector<1xf32> to vector<1x1x1x1xf32>
    %122 = vector.extract %121[0, 0, 0, 0] : f32 from vector<1x1x1x1xf32>
    %c7_i32 = arith.constant 7 : i32
    %123 = vector.broadcast %c7_i32 : i32 to vector<1x16x16xi32>
    %124 = arith.andi %4, %123 : vector<1x16x16xi32>
    %c0_i32_24 = arith.constant 0 : i32
    %125 = vector.broadcast %c0_i32_24 : i32 to vector<1x16x16xi32>
    %126 = arith.cmpi eq, %124, %125 : vector<1x16x16xi32>
    %c7_i32_25 = arith.constant 7 : i32
    %127 = vector.broadcast %c7_i32_25 : i32 to vector<1x16x16xi32>
    %128 = arith.andi %5, %127 : vector<1x16x16xi32>
    %c0_i32_26 = arith.constant 0 : i32
    %129 = vector.broadcast %c0_i32_26 : i32 to vector<1x16x16xi32>
    %130 = arith.cmpi eq, %128, %129 : vector<1x16x16xi32>
    %131 = arith.andi %126, %130 : vector<1x16x16xi1>
    %132 = arith.extui %131 : vector<1x16x16xi1> to vector<1x16x16xi32>
    %133 = arith.sitofp %132 : vector<1x16x16xi32> to vector<1x16x16xf32>
    %134 = arith.mulf %2, %133 : vector<1x16x16xf32>
    %135 = arith.mulf %134, %3 : vector<1x16x16xf32>
    %136 = vector.extract_strided_slice %135 {offsets = [0, 0, 8], sizes = [1, 16, 8], strides = [1, 1, 1]} : vector<1x16x16xf32> to vector<1x16x8xf32>
    %137 = vector.extract_strided_slice %135 {offsets = [0, 0, 0], sizes = [1, 16, 8], strides = [1, 1, 1]} : vector<1x16x16xf32> to vector<1x16x8xf32>
    %138 = arith.subf %136, %137 : vector<1x16x8xf32>
    %139 = math.absf %138 : vector<1x16x8xf32>
    %140 = vector.extract_strided_slice %134 {offsets = [0, 0, 8], sizes = [1, 16, 8], strides = [1, 1, 1]} : vector<1x16x16xf32> to vector<1x16x8xf32>
    %141 = vector.extract_strided_slice %134 {offsets = [0, 0, 0], sizes = [1, 16, 8], strides = [1, 1, 1]} : vector<1x16x16xf32> to vector<1x16x8xf32>
    %142 = arith.mulf %140, %141 : vector<1x16x8xf32>
    %143 = arith.mulf %139, %142 : vector<1x16x8xf32>
    %144 = vector.shape_cast %143 : vector<1x16x8xf32> to vector<1x1x16x8xf32>
    %cst_27 = arith.constant dense<0.000000e+00> : vector<1xf32>
    %145 = vector.multi_reduction <add>, %144, %cst_27 [1, 2, 3] : vector<1x1x16x8xf32> to vector<1xf32>
    %146 = vector.shape_cast %145 : vector<1xf32> to vector<1x1x1x1xf32>
    %147 = vector.extract %146[0, 0, 0, 0] : f32 from vector<1x1x1x1xf32>
    %cst_28 = arith.constant 0.000000e+00 : f32
    %148 = arith.addf %cst_28, %147 : f32
    %149 = vector.extract_strided_slice %135 {offsets = [0, 8, 0], sizes = [1, 8, 16], strides = [1, 1, 1]} : vector<1x16x16xf32> to vector<1x8x16xf32>
    %150 = vector.extract_strided_slice %135 {offsets = [0, 0, 0], sizes = [1, 8, 16], strides = [1, 1, 1]} : vector<1x16x16xf32> to vector<1x8x16xf32>
    %151 = arith.subf %149, %150 : vector<1x8x16xf32>
    %152 = math.absf %151 : vector<1x8x16xf32>
    %153 = vector.extract_strided_slice %134 {offsets = [0, 8, 0], sizes = [1, 8, 16], strides = [1, 1, 1]} : vector<1x16x16xf32> to vector<1x8x16xf32>
    %154 = vector.extract_strided_slice %134 {offsets = [0, 0, 0], sizes = [1, 8, 16], strides = [1, 1, 1]} : vector<1x16x16xf32> to vector<1x8x16xf32>
    %155 = arith.mulf %153, %154 : vector<1x8x16xf32>
    %156 = arith.mulf %152, %155 : vector<1x8x16xf32>
    %157 = vector.shape_cast %156 : vector<1x8x16xf32> to vector<1x1x8x16xf32>
    %cst_29 = arith.constant dense<0.000000e+00> : vector<1xf32>
    %158 = vector.multi_reduction <add>, %157, %cst_29 [1, 2, 3] : vector<1x1x8x16xf32> to vector<1xf32>
    %159 = vector.shape_cast %158 : vector<1xf32> to vector<1x1x1x1xf32>
    %160 = vector.extract %159[0, 0, 0, 0] : f32 from vector<1x1x1x1xf32>
    %161 = arith.addf %148, %160 : f32
    %162 = vector.shape_cast %134 : vector<1x16x16xf32> to vector<1x1x16x16xf32>
    %cst_30 = arith.constant dense<0.000000e+00> : vector<1xf32>
    %163 = vector.multi_reduction <add>, %162, %cst_30 [1, 2, 3] : vector<1x1x16x16xf32> to vector<1xf32>
    %164 = vector.shape_cast %163 : vector<1xf32> to vector<1x1x1x1xf32>
    %165 = vector.extract %164[0, 0, 0, 0] : f32 from vector<1x1x1x1xf32>
    %166 = tpu.iota {dimensions = array<i32: 1>} : vector<8x128xi32>
    %167 = tpu.iota {dimensions = array<i32: 0>} : vector<8x128xi32>
    %cst_31 = arith.constant 0.000000e+00 : f32
    %168 = vector.broadcast %cst_31 : f32 to vector<8x128xf32>
    %c0_i32_32 = arith.constant 0 : i32
    %169 = vector.broadcast %c0_i32_32 : i32 to vector<8x128xi32>
    %170 = arith.cmpi eq, %167, %169 : vector<8x128xi32>
    %c0_i32_33 = arith.constant 0 : i32
    %171 = vector.broadcast %c0_i32_33 : i32 to vector<8x128xi32>
    %172 = arith.cmpi eq, %166, %171 : vector<8x128xi32>
    %173 = arith.andi %170, %172 : vector<8x128xi1>
    %174 = vector.broadcast %32 : f32 to vector<8x128xf32>
    %175 = arith.select %173, %174, %168 : vector<8x128xi1>, vector<8x128xf32>
    %c1_i32_34 = arith.constant 1 : i32
    %176 = vector.broadcast %c1_i32_34 : i32 to vector<8x128xi32>
    %177 = arith.cmpi eq, %167, %176 : vector<8x128xi32>
    %c0_i32_35 = arith.constant 0 : i32
    %178 = vector.broadcast %c0_i32_35 : i32 to vector<8x128xi32>
    %179 = arith.cmpi eq, %166, %178 : vector<8x128xi32>
    %180 = arith.andi %177, %179 : vector<8x128xi1>
    %181 = vector.broadcast %36 : f32 to vector<8x128xf32>
    %182 = arith.select %180, %181, %175 : vector<8x128xi1>, vector<8x128xf32>
    %c0_i32_36 = arith.constant 0 : i32
    %183 = vector.broadcast %c0_i32_36 : i32 to vector<8x128xi32>
    %184 = arith.cmpi eq, %167, %183 : vector<8x128xi32>
    %c1_i32_37 = arith.constant 1 : i32
    %185 = vector.broadcast %c1_i32_37 : i32 to vector<8x128xi32>
    %186 = arith.cmpi eq, %166, %185 : vector<8x128xi32>
    %187 = arith.andi %184, %186 : vector<8x128xi1>
    %188 = vector.broadcast %75 : f32 to vector<8x128xf32>
    %189 = arith.select %187, %188, %182 : vector<8x128xi1>, vector<8x128xf32>
    %c1_i32_38 = arith.constant 1 : i32
    %190 = vector.broadcast %c1_i32_38 : i32 to vector<8x128xi32>
    %191 = arith.cmpi eq, %167, %190 : vector<8x128xi32>
    %c1_i32_39 = arith.constant 1 : i32
    %192 = vector.broadcast %c1_i32_39 : i32 to vector<8x128xi32>
    %193 = arith.cmpi eq, %166, %192 : vector<8x128xi32>
    %194 = arith.andi %191, %193 : vector<8x128xi1>
    %195 = vector.broadcast %79 : f32 to vector<8x128xf32>
    %196 = arith.select %194, %195, %189 : vector<8x128xi1>, vector<8x128xf32>
    %c0_i32_40 = arith.constant 0 : i32
    %197 = vector.broadcast %c0_i32_40 : i32 to vector<8x128xi32>
    %198 = arith.cmpi eq, %167, %197 : vector<8x128xi32>
    %c2_i32 = arith.constant 2 : i32
    %199 = vector.broadcast %c2_i32 : i32 to vector<8x128xi32>
    %200 = arith.cmpi eq, %166, %199 : vector<8x128xi32>
    %201 = arith.andi %198, %200 : vector<8x128xi1>
    %202 = vector.broadcast %118 : f32 to vector<8x128xf32>
    %203 = arith.select %201, %202, %196 : vector<8x128xi1>, vector<8x128xf32>
    %c1_i32_41 = arith.constant 1 : i32
    %204 = vector.broadcast %c1_i32_41 : i32 to vector<8x128xi32>
    %205 = arith.cmpi eq, %167, %204 : vector<8x128xi32>
    %c2_i32_42 = arith.constant 2 : i32
    %206 = vector.broadcast %c2_i32_42 : i32 to vector<8x128xi32>
    %207 = arith.cmpi eq, %166, %206 : vector<8x128xi32>
    %208 = arith.andi %205, %207 : vector<8x128xi1>
    %209 = vector.broadcast %122 : f32 to vector<8x128xf32>
    %210 = arith.select %208, %209, %203 : vector<8x128xi1>, vector<8x128xf32>
    %c0_i32_43 = arith.constant 0 : i32
    %211 = vector.broadcast %c0_i32_43 : i32 to vector<8x128xi32>
    %212 = arith.cmpi eq, %167, %211 : vector<8x128xi32>
    %c3_i32_44 = arith.constant 3 : i32
    %213 = vector.broadcast %c3_i32_44 : i32 to vector<8x128xi32>
    %214 = arith.cmpi eq, %166, %213 : vector<8x128xi32>
    %215 = arith.andi %212, %214 : vector<8x128xi1>
    %216 = vector.broadcast %161 : f32 to vector<8x128xf32>
    %217 = arith.select %215, %216, %210 : vector<8x128xi1>, vector<8x128xf32>
    %c1_i32_45 = arith.constant 1 : i32
    %218 = vector.broadcast %c1_i32_45 : i32 to vector<8x128xi32>
    %219 = arith.cmpi eq, %167, %218 : vector<8x128xi32>
    %c3_i32_46 = arith.constant 3 : i32
    %220 = vector.broadcast %c3_i32_46 : i32 to vector<8x128xi32>
    %221 = arith.cmpi eq, %166, %220 : vector<8x128xi32>
    %222 = arith.andi %219, %221 : vector<8x128xi1>
    %223 = vector.broadcast %165 : f32 to vector<8x128xf32>
    %224 = arith.select %222, %223, %217 : vector<8x128xi1>, vector<8x128xf32>
    %c0_47 = arith.constant 0 : index
    %c0_48 = arith.constant 0 : index
    %c0_49 = arith.constant 0 : index
    %225 = vector.load %arg4[%c0_47, %c0_48, %c0_49] : memref<1x8x128xf32, #tpu.memory_space<vmem>>, vector<1x8x128xf32>
    %226 = vector.shape_cast %225 : vector<1x8x128xf32> to vector<8x128xf32>
    %227 = vector.shape_cast %224 : vector<8x128xf32> to vector<1x8x128xf32>
    tpu.vector_store %arg4[%c0_47, %c0_48, %c0_49], %227 {strides = array<i32>} : memref<1x8x128xf32, #tpu.memory_space<vmem>>, vector<1x8x128xf32>,
    return
  }
  func.func @transform_0(%arg0: i32) -> (i32, i32, i32) {
    %c0_i32 = arith.constant 0 : i32
    %c0_i32_0 = arith.constant 0 : i32
    %c0_i32_1 = arith.constant 0 : i32
    return %arg0, %c0_i32, %c0_i32_0 : i32, i32, i32
  }
  func.func @transform_1(%arg0: i32) -> (i32, i32, i32) {
    %c0_i32 = arith.constant 0 : i32
    %c0_i32_0 = arith.constant 0 : i32
    %c0_i32_1 = arith.constant 0 : i32
    return %arg0, %c0_i32, %c0_i32_0 : i32, i32, i32
  }
  func.func @transform_2(%arg0: i32) -> (i32, i32, i32) {
    %c0_i32 = arith.constant 0 : i32
    %c0_i32_0 = arith.constant 0 : i32
    %c0_i32_1 = arith.constant 0 : i32
    return %arg0, %c0_i32, %c0_i32_0 : i32, i32, i32
  }
  func.func @transform_3(%arg0: i32) -> (i32, i32, i32) {
    %c0_i32 = arith.constant 0 : i32
    %c0_i32_0 = arith.constant 0 : i32
    %c0_i32_1 = arith.constant 0 : i32
    return %arg0, %c0_i32, %c0_i32_0 : i32, i32, i32
  }
}

</mosaic_0001>

<bundles_post_ra>
// kernel: _gradient_loss_impl.1
= control target key start
LH: loop header
LB: loop body
LE: loop exit
PB: predicated region body
PF: predicated region fallthrough
CT: control target
= control target key end

     0   :  { %8 = vsyncpa [#allocation3], 0  ;;  %s1550_s0 = inlined_call_operand.hbm [shape: f32[2,16,16], index: 0, kind: input, shape index: {}]   ;;  %s1551_s1 = inlined_call_operand.hbm [shape: f32[2,16,16], index: 1, kind: input, shape index: {}]   ;;  %s1552_s2 = inlined_call_operand.hbm [shape: f32[2,16,16], index: 2, kind: input, shape index: {}]   ;;  %s1553_s3 = inlined_call_operand.vmem [shape: f32[2,8,128], index: 3, kind: output, shape index: {}]  }
   0x1   :  { %10 = vsyncpa [#allocation3 + $0x1], 0 }
   0x2   :  { %11 = vsyncpa [#allocation5], 0 }
   0x3   :  { %13 = vsyncpa [#allocation5 + $0x1], 0  ;;  %s1114_s12 = smov 0   ;;  %s1116_s13 = smov 0  }
   0x4   :  { %s1118_s14 = smov 0   ;;  %s1120_s15 = smov 0  }
   0x5 LB: > { %s1133_s16 = sadd.s32 4294967295, %s1078_s15   ;;  %s1136_s17 = sadd.s32 1, %s1078_s15   ;;  %s1078_s15 = sphi %s1120_s15, %s1580_s15   ;;  %s1074_s14 = sphi %s1118_s14, %s1579_s14   ;;  %s1070_s13 = sphi %s1116_s13, %s1578_s13   ;;  %s1066_s12 = sphi %s1114_s12, %s1577_s12  }
   0x6   : > { %s23_s18 = ssub.s32 %s1078_s15, %s1136_s17  ;;  %s26_s19 = sadd.s32 1, %s1074_s14 }
   0x7   : > { %p24_p0 = scmp.eq.s32.totalorder %s23_s18, 0  ;;  %p33_p1 = scmp.ne.s32.totalorder %s1074_s14, %s1070_s13 }
   0x8   : > { %p34_p2 = scmp.eq.s32.totalorder %s1078_s15, 0  ;;  %p39_p3 = scmp.ne.s32.totalorder %s1070_s13, %s1066_s12 }
   0x9   : > { %s1146_s20 = scalar_select %p24_p0, %s1074_s14, %s26_s19  }
   0xa   : > { %p35_p4 = por %p34_p2, %p33_p1  ;;  %p40_p5 = scmp.eq.s32.totalorder %s1133_s16, 0 }
   0xb   : > { %p906_p6 = scmp.lt.s32.totalorder %s1078_s15, 2  ;;  %s141_s22 = sand.u32 1, %s1074_s14  }
   0xc   : > { %p1150_p7 = por %p40_p5, %p39_p3  ;;  %s1157_s23 = sshll.u32 %s141_s22, 4 }
   0xd   : > { %s1160_s24 = sshll.u32 %s1078_s15, 8  ;;  %p1162_p8 = pnand %p906_p6, %p35_p4 }
   0xe   : > { %s1555_s21 = scalar_select %p1150_p7, 1, 0 }
   0xf   : > { %s162_s26 = sand.u32 1, %s1078_s15   ;;  %s1171_s29 = scalar_lea.hbm %s1551_s1, %s1160_s24 }
  0x10   : > { %s166_s30 = scalar_lea.vmem [#allocation4], %s1157_s23  ;;  %s1178_s5 = scalar_lea.sflag [#allocation5], %s162_s26 }
  0x11   : > { %s173_s4 = sshll.u32 %s166_s30, 4  ;;  %s950_s6 = scalar_lea.hbm %s1171_s29, 256  ;;  %s1175_s4 = int_to_ptr.vmem [resolvable:$true] %s173_s4 }
  0x12   : > { %p951_p11 = scmp.ne.s32.totalorder %s1171_s29, %s950_s6  ;;  %p1184_p12 = pneg %p1162_p8 }
  0x13   : > { %s955_s10 = scalar_lea.hbm %s1551_s1, 512  ;;  %p956_p1 = scmp.lt.u32.totalorder %s1171_s29, %s1551_s1 }
  0x14   : > { %p953_p13 = pnand %p1184_p12, %p951_p11  ;;  %p957_p2 = scmp.lt.u32.totalorder %s955_s10, %s950_s6 }
  0x15   : > { %p959_p4 = scmp.lt.u32.totalorder %s950_s6, %s1171_s29 }
  0x16   : > { %p954_p0 = pneg %p953_p13  ;;  %p958_p3 = por %p957_p2, %p956_p1 }
  0x18   : > { %p960_p5 = por %p959_p4, %p958_p3 }
  0x1a   : > { %p961_p6 = pnand %p960_p5, %p954_p0 }
  0x1c   : > { %964 = shalt.err (!%p961_p6)
}
  0x1d   : > { %s965_s18 = scalar_lea.vmem %s1175_s4, 256  ;;  %s1080_s19 = smov [#allocation4]  }
  0x1e   : > { %p966_p11 = scmp.ne.s32.totalorder %s1175_s4, %s965_s18  ;;  %s970_s26 = sshll.u32 %s1080_s19, 4  ;;  %s971_s26 = int_to_ptr.vmem [resolvable:$false] %s970_s26 }
  0x1f   : > { %s972_s27 = scalar_lea.vmem %s971_s26, 512  ;;  %p973_p10 = scmp.lt.s32.totalorder %s1175_s4, %s971_s26 }
  0x20   : > { %p968_p13 = pnand %p966_p11, %p1184_p12  ;;  %p974_p7 = scmp.lt.s32.totalorder %s972_s27, %s965_s18 }
  0x22   : > { %p969_p9 = pneg %p968_p13  ;;  %p975_p1 = por %p974_p7, %p973_p10 }
  0x24   : > { %p976_p2 = pnand %p975_p1, %p969_p9 }
  0x26   : > { %979 = shalt.err (!%p976_p2)
}
  0x27   : > { %s1081_s28 = smov 128   ;;  %s1082_s30 = smov 8  }
  0x28   : > { %902 = dma.hbm_to_vmem [thread:$0]  (!%p1162_p8), %s1171_s29, 256, %s1175_s4, %s1178_s5, %s1081_s28, %s1081_s28, %s1082_s30  }
  0x29   : > { %p1558_p7 = scmp.lt.s32.totalorder %s1078_s15, 3  ;;  %p1559_p9 = scmp.ge.s32.totalorder %s1078_s15, 1 }
  0x2a   : > { %s1223_s10 = scalar_lea.hbm %s1550_s0, %s1160_s24  ;;  %s145_s11 = scalar_lea.vmem [#allocation2], %s1157_s23 }
  0x2b   : > { %p1215_p10 = pnand %p1559_p9, %p1558_p7  ;;  %s152_s12 = sshll.u32 %s145_s11, 4  ;;  %s1226_s12 = int_to_ptr.vmem [resolvable:$true] %s152_s12 }
  0x2c   : > { %s1232_s15 = scalar_lea.hbm %s1552_s2, %s1160_s24  ;;  %s1236_s18 = scalar_lea.sflag [#allocation3], %s141_s22 }
  0x2d   : > { %s1560_s6 = scalar_select %p1215_p10, 1, 0 }
  0x2e   : > { %s980_s19 = scalar_lea.hbm %s1223_s10, 256  ;;  %s985_s8 = scalar_lea.hbm %s1550_s0, 512 }
  0x2f   : > { %p981_p0 = scmp.ne.s32.totalorder %s1223_s10, %s980_s19  ;;  %p986_p5 = scmp.lt.u32.totalorder %s1223_s10, %s1550_s0 }
  0x30   : > { %p987_p6 = scmp.lt.u32.totalorder %s985_s8, %s980_s19  ;;  %p989_p13 = scmp.lt.u32.totalorder %s980_s19, %s1223_s10 }
  0x31   : > { %p983_p3 = pnand %p981_p0, %p1184_p12 }
  0x32   : > { %p988_p11 = por %p987_p6, %p986_p5 }
  0x33   : > { %p984_p4 = pneg %p983_p3 }
  0x34   : > { %p990_p1 = por %p989_p13, %p988_p11 }
  0x36   : > { %p991_p2 = pnand %p990_p1, %p984_p4 }
  0x38   : > { %994 = shalt.err (!%p991_p2)
}
  0x39   : > { %s995_s22 = scalar_lea.vmem %s1226_s12, 256  ;;  %s1083_s24 = smov [#allocation2]  }
  0x3a   : > { %p996_p7 = scmp.ne.s32.totalorder %s1226_s12, %s995_s22  ;;  %s1000_s29 = sshll.u32 %s1083_s24, 4  ;;  %s1001_s29 = int_to_ptr.vmem [resolvable:$false] %s1000_s29 }
  0x3b   : > { %s1002_s4 = scalar_lea.vmem %s1001_s29, 512  ;;  %p1003_p3 = scmp.lt.s32.totalorder %s1226_s12, %s1001_s29 }
  0x3c   : > { %p998_p9 = pnand %p996_p7, %p1184_p12  ;;  %p1004_p10 = scmp.lt.s32.totalorder %s1002_s4, %s995_s22 }
  0x3e   : > { %p999_p0 = pneg %p998_p9  ;;  %p1005_p5 = por %p1004_p10, %p1003_p3 }
  0x40   : > { %p1006_p6 = pnand %p1005_p5, %p999_p0 }
  0x42   : > { %1009 = shalt.err (!%p1006_p6)
}
  0x43   : > { %899 = dma.hbm_to_vmem [thread:$0]  (!%p1162_p8), %s1223_s10, 256, %s1226_s12, %s1236_s18, %s1081_s28, %s1081_s28, %s1082_s30  }
  0x44   : > { %s187_s19 = scalar_lea.vmem [#allocation6], %s1157_s23  ;;  %s1010_s27 = scalar_lea.hbm %s1232_s15, 256 }
  0x45   : > { %s194_s26 = sshll.u32 %s187_s19, 4  ;;  %p1011_p10 = scmp.ne.s32.totalorder %s1232_s15, %s1010_s27  ;;  %s1264_s26 = int_to_ptr.vmem [resolvable:$true] %s194_s26 }
  0x46   : > { %s1015_s11 = scalar_lea.hbm %s1552_s2, 512  ;;  %p1016_p13 = scmp.lt.u32.totalorder %s1232_s15, %s1552_s2 }
  0x47   : > { %p1013_p4 = pnand %p1011_p10, %p1184_p12  ;;  %p1017_p1 = scmp.lt.u32.totalorder %s1015_s11, %s1010_s27 }
  0x48   : > { %p1019_p7 = scmp.lt.u32.totalorder %s1010_s27, %s1232_s15 }
  0x49   : > { %p1014_p11 = pneg %p1013_p4  ;;  %p1018_p2 = por %p1017_p1, %p1016_p13 }
  0x4b   : > { %p1020_p9 = por %p1019_p7, %p1018_p2 }
  0x4d   : > { %p1021_p0 = pnand %p1020_p9, %p1014_p11 }
  0x4f   : > { %1024 = shalt.err (!%p1021_p0)
}
  0x50   : > { %s1025_s23 = scalar_lea.vmem %s1264_s26, 256  ;;  %s1084_s10 = smov [#allocation6]  }
  0x51   : > { %p1026_p3 = scmp.ne.s32.totalorder %s1264_s26, %s1025_s23  ;;  %s1030_s12 = sshll.u32 %s1084_s10, 4  ;;  %s1031_s12 = int_to_ptr.vmem [resolvable:$false] %s1030_s12 }
  0x52   : > { %s1032_s18 = scalar_lea.vmem %s1031_s12, 512  ;;  %p1033_p10 = scmp.lt.s32.totalorder %s1264_s26, %s1031_s12 }
  0x53   : > { %p1028_p5 = pnand %p1026_p3, %p1184_p12  ;;  %p1034_p4 = scmp.lt.s32.totalorder %s1032_s18, %s1025_s23 }
  0x55   : > { %p1029_p6 = pneg %p1028_p5  ;;  %p1035_p13 = por %p1034_p4, %p1033_p10 }
  0x57   : > { %p1036_p1 = pnand %p1035_p13, %p1029_p6 }
  0x59   : > { %1039 = shalt.err (!%p1036_p1)
}
  0x5a   : > { %905 = dma.hbm_to_vmem [thread:$0]  (!%p1162_p8), %s1232_s15, 256, %s1264_s26, %s1178_s5, %s1081_s28, %s1081_s28, %s1082_s30  }
  0x5b   : > { %p1561_p12 = scmp.ne.s32.totalorder %s1560_s6, 0 }
  0x5c   : > { %s208_s7 = sand.u32 (!%p1561_p12), 1, %s1070_s13   ;;  %p1562_p11 = scmp.ne.s32.totalorder (!%p1561_p12), %s1555_s21, 0 }
  0x5d   : > { %206 = sbr.rel (%p1561_p12) target bundleno = 591 (0x24f), region = 32  ;;  %s1294_s29 = sshll.u32 (!%p1561_p12), %s208_s7, 4 }
  0x5e   : > { %s209_s4 = scalar_lea.sflag (!%p1561_p12), [#allocation3], %s208_s7  ;;  %s212_s19 = scalar_lea.vmem (!%p1561_p12), [#allocation2], %s1294_s29 }
  0x64   : > { %1057 = dma.done.wait (%p1562_p11), %s209_s4, 256  }
  0x65   : > { %1059 = vsyncadd (%p1562_p11), %s209_s4, 4294967040  ;;  %s217_s25 = sand.u32 1, %s1133_s16   ;;  %s221_s28 = scalar_lea.vmem [#allocation4], %s1294_s29 }
  0x66   : > { %s218_s5 = scalar_lea.sflag [#allocation5], %s217_s25 }
  0x67   : > { %1061 = dma.done.wait (%p1562_p11), %s218_s5, 512  }
  0x68   : > { %1063 = vsyncadd (%p1562_p11), %s218_s5, 4294966784  ;;  %v274_v0 = vlaneseq  ;;  %s230_s21 = scalar_lea.vmem [#allocation6], %s1294_s29  ;;  %s1085_s30 = smov 1   ;;  %v1086_v13 = vmov 0.0   ;;  %v266_v15 = vld [vmem:[%s212_s19] sm:$0xff]  ;;  %v267_v17 = vld [vmem:[%s212_s19 + $0x8] sm:$0xff] }
  0x69   : > { %v1321_v11 = vld [vmem:[%s230_s21] sm:$0xff]  ;;  %v1344_v20 = vld [vmem:[%s230_s21 + $0x8] sm:$0xff]  ;;  %s1087_s6 = smov 2   ;;  %s1088_s15 = smov 4   ;;  %vm327_vm15 = vcmask 1040384  }
  0x6a   : > { %v1307_v1 = vshrl.u32 %v274_v0, 7  ;;  %v1309_v2 = vand.u32 127, %v274_v0  ;;  %295 = vrot.lane.b32.xlu1 %v1321_v11, %s1085_s30  ;;  %v268_v16 = vld [vmem:[%s221_s28] sm:$0xff]  ;;  %v269_v22 = vld [vmem:[%s221_s28 + $0x8] sm:$0xff]  ;;  %s1089_s26 = smov 8   ;;  %s1090_s27 = smov 127  }
  0x6b   : > { %v272_v21 = vsub.f32 %v266_v15, %v268_v16  ;;  %v273_v26 = vsub.f32 %v267_v17, %v269_v22  ;;  %s1091_s8 = smov 126   ;;  %s1092_s9 = smov 124  }
  0x6c   : > { %v381_v3 = vand.u32 1, %v1307_v1  ;;  %v385_v4 = vand.u32 1, %v1309_v2  ;;  %v276_v5 = vadd.s32 8, %v1307_v1  ;;  %v500_v6 = vand.u32 3, %v1309_v2  ;;  %s1093_s11 = smov 120   ;;  %p262_p8 = scmp.lt.s32.totalorder %s1133_s16, 1 }
  0x6d   : > { %v496_v7 = vand.u32 3, %v1307_v1  ;;  %v1360_v25 = vmul.f32 %v272_v21, %v1321_v11  ;;  %v614_v28 = vand.u32 7, %v1309_v2  ;;  %v610_v31 = vand.u32 7, %v1307_v1 }
  0x6e   : > { %vm383_vm0 = vcmp.eq.s32.totalorder %v381_v3, 0  ;;  %vm1316_vm1 = vcmp.eq.s32.totalorder %v385_v4, 0  ;;  %v382_v9 = vand.u32 1, %v276_v5  ;;  %v497_v10 = vand.u32 3, %v276_v5  ;;  %297 = vrot.lane.b32.xlu1 %v1344_v20, %s1085_s30  ;;  %s1582_s16 = smov (!%p262_p8, %s1133_s16), 1 }
  0x6f   : > { %vm387_vm2 = vmand %vm383_vm0, %vm1316_vm1  ;;  %vm1325_vm3 = vcmp.eq.s32.totalorder %v500_v6, 0  ;;  %vm1354_vm8 = vcmp.eq.s32.totalorder %v496_v7, 0  ;;  %v611_v27 = vand.u32 7, %v276_v5  ;;  %v1376_v32 = vmul.f32 %v273_v26, %v1344_v20 }
  0x70   : > { %v855_v14 = vsel %vm387_vm2, 1.0, %v1086_v13  ;;  %vm384_vm4 = vcmp.eq.s32.totalorder %v382_v9, 0  ;;  %vm1337_vm5 = vcmp.eq.s32.totalorder %v497_v10, 0  ;;  %vm502_vm9 = vmand %vm1354_vm8, %vm1325_vm3  ;;  %vm1378_vm11 = vcmp.eq.s32.totalorder %v614_v28, 0 }
  0x71   : > { %v1342_v19 = vmul.f32 %v855_v14, %v1321_v11  ;;  %vm388_vm6 = vmand %vm384_vm4, %vm1316_vm1  ;;  %vm613_vm10 = vcmp.eq.s32.totalorder %v611_v27, 0  ;;  %v857_v36 = vsel %vm502_vm9, 1.0, %v1086_v13  ;;  %vm612_vm13 = vcmp.eq.s32.totalorder %v610_v31, 0 }
  0x72   : > { %v856_v23 = vsel %vm388_vm6, 1.0, %v1086_v13  ;;  %vm503_vm7 = vmand %vm1337_vm5, %vm1325_vm3  ;;  %v1397_v38 = vmul.f32 %v857_v36, %v1321_v11  ;;  %vm443_vm0 = vcmask 1041408   ;;  %vm558_vm1 = vcmask 1043456  }
  0x73   : > { %411 = vrot.lane.b32.xlu0 %v1342_v19, %s1087_s6  ;;  %v1366_v29 = vmul.f32 %v856_v23, %v1344_v20  ;;  %v858_v30 = vsel %vm503_vm7, 1.0, %v1086_v13  ;;  %vm617_vm12 = vmand %vm613_vm10, %vm1378_vm11  ;;  %v1394_v37 = vmul.f32 %v1342_v19, %v272_v21  ;;  %vm348_vm2 = vcmask 1046528  }
  0x74   : > { %v1387_v35 = vmul.f32 %v858_v30, %v1344_v20  ;;  %v860_v40 = vsel %vm617_vm12, 1.0, %v1086_v13  ;;  %vm616_vm14 = vmand %vm612_vm13, %vm1378_vm11  ;;  %v1407_v41 = vmul.f32 %v1397_v38, %v272_v21  ;;  %vm354_vm3 = vcmask 130048  }
  0x75   : > { %413 = vrot.lane.b32.xlu1 %v1366_v29, %s1087_s6  ;;  %v1384_v34 = vmul.f32 %v1366_v29, %v273_v26  ;;  %v1411_v42 = vmul.f32 %v860_v40, %v1344_v20  ;;  %v859_v43 = vsel %vm616_vm14, 1.0, %v1086_v13  ;;  %vm356_vm4 = vcmask 129024  }
  0x76   : > { %v1401_v39 = vmul.f32 %v1387_v35, %v273_v26  ;;  %v1415_v44 = vmul.f32 %v859_v43, %v1321_v11  ;;  %vm464_vm5 = vcmask 1045504   ;;  %vm471_vm6 = vcmask 128000  }
  0x77   : > { %283 = vrot.lane.b32.xlu0 %v1360_v25, %s1085_s30  ;;  %v1419_v45 = vmul.f32 %v1411_v42, %v273_v26  ;;  %vm585_vm7 = vcmask 125952   ;;  %vm313_vm8 = vcmask 121856   ;;  %vm429_vm9 = vcmask 113664  }
  0x78   : > { %v1423_v46 = vmul.f32 %v1415_v44, %v272_v21  ;;  %vm544_vm10 = vcmask 97280   ;;  %vm658_vm11 = vcmask 64512   ;;  %vm699_vm12 = vcmp.eq.s32.totalorder %v1307_v1, 0 }
  0x79   : > { %401 = vrot.lane.b32.xlu1 %v1384_v34, %s1087_s6  ;;  %vm700_vm13 = vcmp.eq.s32.totalorder %v1309_v2, 0 }
  0x7a   : > { %vm1502_vm14 = vmand %vm699_vm12, %vm700_vm13 }
  0x7b   : > { %285 = vrot.lane.b32.xlu0 %v1376_v32, %s1085_s30  ;;  %s854_s30 = sshll.u32 %s1582_s16, 3 }
  0x7d   : > { %516 = vrot.lane.b32.xlu1 %v1401_v39, %s1088_s15 }
  0x7f   : > { %399 = vrot.lane.b32.xlu0 %v1394_v37, %s1087_s6 }
  0x81   : > { %528 = vrot.lane.b32.xlu1 %v1387_v35, %s1088_s15 }
  0x83   : > { %514 = vrot.lane.b32.xlu0 %v1407_v41, %s1088_s15 }
  0x85   : > { %630 = vrot.lane.b32.xlu1 %v1419_v45, %s1089_s26 }
  0x87   : > { %526 = vrot.lane.b32.xlu0 %v1397_v38, %s1088_s15 }
  0x89   : > { %642 = vrot.lane.b32.xlu1 %v1411_v42, %s1089_s26 }
  0x8b   : > { %628 = vrot.lane.b32.xlu0 %v1423_v46, %s1089_s26 }
  0x8f   : > { %640 = vrot.lane.b32.xlu0 %v1415_v44, %s1089_s26 }
  0xdc   : > { %v296_v47 = vpop.permute.xlu1 %295 }
  0xdd   : > { %v301_v53 = vmul.f32 %v296_v47, %v1321_v11 }
  0xe0   : > { %v298_v49 = vpop.permute.xlu1 %297 }
  0xe1   : > { %v302_v60 = vmul.f32 %v298_v49, %v1344_v20  ;;  %v328_v49 = vrot.slane %v1360_v25, 7 }
  0xe5   : > { %v412_v48 = vpop.permute.xlu0 %411 }
  0xe6   : > { %v417_v6 = vmul.f32 %v412_v48, %v1342_v19 }
  0xe7   : > { %v414_v52 = vpop.permute.xlu1 %413 }
  0xe8   : > { %v418_v7 = vmul.f32 %v414_v52, %v1366_v29  ;;  %v337_v52 = vrot.slane %v1321_v11, 7 }
  0xe9   : > { %v284_v50 = vpop.permute.xlu0 %283 }
  0xea   : > { %v289_v51 = vsub.f32 %v1360_v25, %v284_v50  ;;  %v329_v50 = vrot.slane %v1376_v32, 7 }
  0xeb   : > { %v402_v58 = vpop.permute.xlu1 %401 }
  0xec   : > { %v291_v54 = vand.u32 2147483647, %v289_v51  ;;  %v406_v59 = vsub.f32 %v1384_v34, %v402_v58  ;;  %v330_v51 = vsel %vm327_vm15, %v328_v49, %v329_v50  ;;  %v333_v58 = vsub.f32 %v1360_v25, %v328_v49 }
  0xed   : > { %v286_v55 = vpop.permute.xlu0 %285 }
  0xee   : > { %v303_v56 = vmul.f32 %v301_v53, %v291_v54  ;;  %v290_v57 = vsub.f32 %v1376_v32, %v286_v55  ;;  %v408_v0 = vand.u32 2147483647, %v406_v59  ;;  %v338_v53 = vrot.slane %v1344_v20, 7 }
  0xef   : > { %v517_v4 = vpop.permute.xlu1 %516  ;;  %v444_v54 = vrot.slane %v1394_v37, 6  ;;  %v445_v55 = vrot.slane %v1384_v34, 6  ;;  %v334_v59 = vsub.f32 %v1376_v32, %v330_v51 }
  0xf0   : > { %v292_v61 = vand.u32 2147483647, %v290_v57  ;;  %307 = vrot.lane.b32.xlu0 %v303_v56, %s1090_s27  ;;  %v521_v5 = vsub.f32 %v1401_v39, %v517_v4  ;;  %v420_v12 = vmul.f32 %v418_v7, %v408_v0  ;;  %v559_v56 = vrot.slane %v1407_v41, 4 }
  0xf1   : > { %v400_v62 = vpop.permute.xlu0 %399  ;;  %v560_v57 = vrot.slane %v1401_v39, 4  ;;  %v569_v4 = vrot.slane %v1387_v35, 4  ;;  %v342_v7 = vmul.f32 %v337_v52, %v1321_v11  ;;  %v449_v32 = vsub.f32 %v1394_v37, %v444_v54 }
  0xf2   : > { %v304_v63 = vmul.f32 %v302_v60, %v292_v61  ;;  %v405_v3 = vsub.f32 %v1394_v37, %v400_v62  ;;  %v523_v9 = vand.u32 2147483647, %v521_v5  ;;  %v339_v60 = vsel %vm327_vm15, %v337_v52, %v338_v53 }
  0xf3   : > { %v529_v15 = vpop.permute.xlu1 %528  ;;  %v446_v61 = vsel %vm443_vm0, %v444_v54, %v445_v55  ;;  %v453_v62 = vrot.slane %v1342_v19, 6  ;;  %v561_v0 = vsel %vm558_vm1, %v559_v56, %v560_v57  ;;  %v335_v5 = vand.u32 2147483647, %v333_v58 }
  0xf4   : > { %v407_v8 = vand.u32 2147483647, %v405_v3  ;;  %309 = vrot.lane.b32.xlu1 %v304_v63, %s1090_s27  ;;  %v533_v16 = vmul.f32 %v529_v15, %v1387_v35  ;;  %v454_v63 = vrot.slane %v1366_v29, 6  ;;  %v568_v3 = vrot.slane %v1397_v38, 4  ;;  %s265_s27 = scalar_lea.vmem %s1553_s3, %s854_s30 }
  0xf5   : > { %v515_v10 = vpop.permute.xlu0 %514  ;;  %v343_v25 = vmul.f32 %v339_v60, %v1344_v20  ;;  %v484_v52 = vsel %vm354_vm3, %v1342_v19, 0.0  ;;  %v485_v53 = vsel %vm354_vm3, %v1366_v29, 0.0  ;;  %vm704_vm15 = vcmp.eq.s32.totalorder %v1307_v1, 1 }
  0xf6   : > { %v419_v13 = vmul.f32 %v417_v6, %v407_v8  ;;  %v520_v14 = vsub.f32 %v1407_v41, %v515_v10  ;;  %v535_v17 = vmul.f32 %v533_v16, %v523_v9  ;;  %v336_v6 = vand.u32 2147483647, %v334_v59 }
  0xf7   : > { %v631_v23 = vpop.permute.xlu1 %630  ;;  %v450_v8 = vsub.f32 %v1384_v34, %v446_v61  ;;  %v455_v9 = vsel %vm443_vm0, %v453_v62, %v454_v63  ;;  %v564_v10 = vsub.f32 %v1407_v41, %v559_v56  ;;  %v451_v16 = vand.u32 2147483647, %v449_v32 }
  0xf8   : > { %425 = vrot.lane.b32.xlu1 %v420_v12, %s1091_s8  ;;  %423 = vrot.lane.b32.xlu0 %v419_v13, %s1091_s8  ;;  %v522_v21 = vand.u32 2147483647, %v520_v14  ;;  %v635_v24 = vsub.f32 %v1419_v45, %v631_v23  ;;  %v565_v12 = vsub.f32 %v1401_v39, %v561_v0  ;;  %v570_v13 = vsel %vm558_vm1, %v568_v3, %v569_v4 }
  0xf9   : > { %v527_v18 = vpop.permute.xlu0 %526  ;;  %v344_v14 = vmul.f32 %v342_v7, %v335_v5  ;;  %v345_v15 = vmul.f32 %v343_v25, %v336_v6  ;;  %v573_v34 = vmul.f32 %v568_v3, %v1397_v38  ;;  %v574_v23 = vmul.f32 %v570_v13, %v1387_v35 }
  0xfa   : > { %v532_v22 = vmul.f32 %v527_v18, %v1397_v38  ;;  %v637_v27 = vand.u32 2147483647, %v635_v24  ;;  %v458_v18 = vmul.f32 %v453_v62, %v1342_v19  ;;  %v567_v37 = vand.u32 2147483647, %v565_v12 }
  0xfb   : > { %v643_v31 = vpop.permute.xlu1 %642  ;;  %v349_v24 = vrot.slane %v344_v14, 1  ;;  %v350_v41 = vrot.slane %v345_v15, 1  ;;  %v486_v56 = vadd.f32 %v485_v53, %v484_v52  ;;  %v598_v19 = vsel %vm354_vm3, %v1397_v38, 0.0 }
  0xfc   : > { %v534_v26 = vmul.f32 %v532_v22, %v522_v21  ;;  %540 = vrot.lane.b32.xlu1 %v535_v17, %s1092_s9  ;;  %v647_v33 = vmul.f32 %v643_v31, %v1411_v42  ;;  %v452_v17 = vand.u32 2147483647, %v450_v8  ;;  %v459_v21 = vmul.f32 %v455_v9, %v1366_v29 }
  0xfd   : > { %v629_v28 = vpop.permute.xlu0 %628  ;;  %v566_v22 = vand.u32 2147483647, %v564_v10  ;;  %v357_v49 = vsel %vm356_vm4, %v350_v41, 0.0  ;;  %v599_v29 = vsel %vm354_vm3, %v1387_v35, 0.0  ;;  %v672_v5 = vsub.f32 %v1419_v45, %v1423_v46 }
  0xfe   : > { %v634_v30 = vsub.f32 %v1423_v46, %v629_v28  ;;  %538 = vrot.lane.b32.xlu0 %v534_v26, %s1092_s9  ;;  %v649_v36 = vmul.f32 %v647_v33, %v637_v27  ;;  %v460_v26 = vmul.f32 %v458_v18, %v451_v16  ;;  %v461_v39 = vmul.f32 %v459_v21, %v452_v17 }
  0xff   : > { %v575_v27 = vmul.f32 %v573_v34, %v566_v22  ;;  %v576_v28 = vmul.f32 %v574_v23, %v567_v37  ;;  %v600_v61 = vadd.f32 %v599_v29, %v598_v19  ;;  %v673_v32 = vand.u32 2147483647, %v672_v5 }
 0x100   : > { %v636_v43 = vand.u32 2147483647, %v634_v30  ;;  %654 = vrot.lane.b32.xlu1 %v649_v36, %s1093_s11  ;;  %v351_v30 = vsel %vm348_vm2, %v349_v24, %v350_v41  ;;  %v465_v31 = vrot.slane %v460_v26, 2  ;;  %v466_v33 = vrot.slane %v461_v39, 2 }
 0x101   : > { %v641_v40 = vpop.permute.xlu0 %640  ;;  %v369_v36 = vsel %vm354_vm3, %v1321_v11, 0.0  ;;  %v674_v8 = vmul.f32 %v1411_v42, %v1415_v44  ;;  %v687_v21 = vsel %vm354_vm3, %v1415_v44, 0.0  ;;  %v688_v22 = vsel %vm354_vm3, %v1411_v42, 0.0 }
 0x102   : > { %v646_v47 = vmul.f32 %v641_v40, %v1415_v44  ;;  %v370_v40 = vsel %vm354_vm3, %v1344_v20, 0.0  ;;  %v467_v51 = vsel %vm464_vm5, %v465_v31, %v466_v33  ;;  %v472_v55 = vsel %vm471_vm6, %v466_v33, 0.0 }
 0x103   : > { %v371_v50 = vadd.f32 %v370_v40, %v369_v36  ;;  %v470_v20 = vsel %vm354_vm3, %v467_v51, 0.0  ;;  %v675_v14 = vmul.f32 %v674_v8, %v673_v32  ;;  %v689_v34 = vadd.f32 %v688_v22, %v687_v21 }
 0x104   : > { %v648_v48 = vmul.f32 %v646_v47, %v636_v43  ;;  %v579_v43 = vrot.slane %v575_v27, 4  ;;  %v580_v47 = vrot.slane %v576_v28, 4  ;;  %v473_v59 = vadd.f32 %v472_v55, %v470_v20 }
 0x105   : > { %v676_v45 = vsel %vm354_vm3, %v675_v14, 0.0  ;;  %vm708_vm0 = vcmp.eq.s32.totalorder %v1309_v2, 1  ;;  %vm722_vm6 = vcmp.eq.s32.totalorder %v1309_v2, 3 }
 0x106   : > { %652 = vrot.lane.b32.xlu0 %v648_v48, %s1093_s11  ;;  %v355_v48 = vsel %vm354_vm3, %v351_v30, 0.0  ;;  %v581_v11 = vsel %vm558_vm1, %v579_v43, %v580_v47  ;;  %v586_v58 = vsel %vm585_vm7, %v580_v47, 0.0  ;;  %vm705_vm1 = vmand %vm704_vm15, %vm700_vm13 }
 0x107   : > { %v358_v54 = vadd.f32 %v357_v49, %v355_v48  ;;  %v584_v57 = vsel %vm354_vm3, %v581_v11, 0.0  ;;  %vm709_vm2 = vmand %vm699_vm12, %vm708_vm0  ;;  %vm715_vm3 = vcmp.eq.s32.totalorder %v1309_v2, 2 }
 0x108   : > { %v587_v60 = vadd.f32 %v586_v58, %v584_v57  ;;  %vm712_vm4 = vmand %vm704_vm15, %vm708_vm0 }
 0x109   : > { %vm1521_vm5 = vmand %vm699_vm12, %vm715_vm3 }
 0x10a   : > { %vm719_vm7 = vmand %vm704_vm15, %vm715_vm3 }
 0x124   : > { %359 = vadd.xlane.f32.xlu1 %v358_v54 }
 0x125   : > { %372 = vadd.xlane.f32.xlu0 %v371_v50 }
 0x128   : > { %474 = vadd.xlane.f32.xlu1 %v473_v59 }
 0x129   : > { %487 = vadd.xlane.f32.xlu0 %v486_v56 }
 0x12c   : > { %601 = vadd.xlane.f32.xlu1 %v600_v61 }
 0x12d   : > { %588 = vadd.xlane.f32.xlu0 %v587_v60 }
 0x162   : > { %v308_v62 = vpop.permute.xlu0 %307 }
 0x163   : > { %v314_v0 = vsel %vm313_vm8, %v308_v62, 0.0 }
 0x166   : > { %v310_v63 = vpop.permute.xlu1 %309 }
 0x167   : > { %v315_v3 = vsel %vm313_vm8, %v310_v63, 0.0  ;;  %vm723_vm8 = vmand %vm699_vm12, %vm722_vm6 }
 0x168   : > { %v316_v4 = vadd.f32 %v315_v3, %v314_v0 }
 0x16a   : > { %v426_v38 = vpop.permute.xlu1 %425  ;;  %317 = vadd.xlane.f32.xlu0 %v316_v4  ;;  %v424_v6 = vpop.permute.xlu0 %423 }
 0x16b   : > { %v431_v35 = vsel %vm429_vm9, %v426_v38, 0.0  ;;  %v430_v7 = vsel %vm429_vm9, %v424_v6, 0.0  ;;  %vm726_vm9 = vmand %vm704_vm15, %vm722_vm6 }
 0x16c   : > { %v432_v25 = vadd.f32 %v431_v35, %v430_v7 }
 0x16e   : > { %v541_v9 = vpop.permute.xlu1 %540  ;;  %433 = vadd.xlane.f32.xlu0 %v432_v25 }
 0x16f   : > { %v546_v12 = vsel %vm544_vm10, %v541_v9, 0.0 }
 0x170   : > { %v539_v10 = vpop.permute.xlu0 %538 }
 0x171   : > { %v545_v13 = vsel %vm544_vm10, %v539_v10, 0.0 }
 0x172   : > { %v547_v15 = vadd.f32 %v546_v12, %v545_v13  ;;  %v655_v46 = vpop.permute.xlu1 %654 }
 0x173   : > { %v660_v17 = vsel %vm658_vm11, %v655_v46, 0.0 }
 0x174   : > { %548 = vadd.xlane.f32.xlu1 %v547_v15 }
 0x178   : > { %v653_v16 = vpop.permute.xlu0 %652  ;;  %677 = vadd.xlane.f32.xlu1 %v676_v45 }
 0x179   : > { %v659_v18 = vsel %vm658_vm11, %v653_v16, 0.0 }
 0x17a   : > { %v661_v37 = vadd.f32 %v660_v17, %v659_v18 }
 0x17c   : > { %662 = vadd.xlane.f32.xlu0 %v661_v37 }
 0x180   : > { %690 = vadd.xlane.f32.xlu0 %v689_v34 }
 0x1b1   : > { %v360_v24 = vpop.xlane.xlu1 %359 }
 0x1b2   : > { %v373_v23 = vpop.xlane.xlu0 %372  ;;  %v361_v26 = vrot.slane %v360_v24, 4 }
 0x1b3   : > { %v374_v39 = vrot.slane %v373_v23, 4 }
 0x1b4   : > { %v362_v30 = vadd.f32 %v361_v26, %v360_v24 }
 0x1b5   : > { %v475_v27 = vpop.xlane.xlu1 %474  ;;  %v375_v33 = vadd.f32 %v374_v39, %v373_v23 }
 0x1b6   : > { %v488_v41 = vpop.xlane.xlu0 %487  ;;  %v476_v31 = vrot.slane %v475_v27, 4  ;;  %v363_v40 = vrot.slane %v362_v30, 2 }
 0x1b7   : > { %v489_v36 = vrot.slane %v488_v41, 4  ;;  %v376_v42 = vrot.slane %v375_v33, 2 }
 0x1b8   : > { %v477_v43 = vadd.f32 %v476_v31, %v475_v27  ;;  %v364_v54 = vadd.f32 %v363_v40, %v362_v30 }
 0x1b9   : > { %v602_v47 = vpop.xlane.xlu1 %601  ;;  %v490_v48 = vadd.f32 %v489_v36, %v488_v41  ;;  %v377_v57 = vadd.f32 %v376_v42, %v375_v33 }
 0x1ba   : > { %v589_v28 = vpop.xlane.xlu0 %588  ;;  %v603_v52 = vrot.slane %v602_v47, 4  ;;  %v478_v53 = vrot.slane %v477_v43, 2  ;;  %v365_v60 = vrot.slane %v364_v54, 1 }
 0x1bb   : > { %v590_v50 = vrot.slane %v589_v28, 4  ;;  %v491_v20 = vrot.slane %v490_v48, 2  ;;  %v378_v0 = vrot.slane %v377_v57, 1 }
 0x1bc   : > { %v604_v19 = vadd.f32 %v603_v52, %v602_v47  ;;  %v479_v61 = vadd.f32 %v478_v53, %v477_v43  ;;  %v366_v25 = vadd.f32 %v365_v60, %v364_v54 }
 0x1bd   : > { %v591_v58 = vadd.f32 %v590_v50, %v589_v28  ;;  %v492_v3 = vadd.f32 %v491_v20, %v490_v48  ;;  %v379_v9 = vadd.f32 %v378_v0, %v377_v57 }
 0x1be   : > { %v605_v38 = vrot.slane %v604_v19, 2  ;;  %v480_v32 = vrot.slane %v479_v61, 1 }
 0x1bf   : > { %v592_v4 = vrot.slane %v591_v58, 2  ;;  %v493_v12 = vrot.slane %v492_v3, 1 }
 0x1c0   : > { %v606_v16 = vadd.f32 %v605_v38, %v604_v19  ;;  %v481_v17 = vadd.f32 %v480_v32, %v479_v61 }
 0x1c1   : > { %v593_v14 = vadd.f32 %v592_v4, %v591_v58  ;;  %v494_v21 = vadd.f32 %v493_v12, %v492_v3 }
 0x1c2   : > { %v607_v26 = vrot.slane %v606_v16, 1 }
 0x1c3   : > { %v594_v34 = vrot.slane %v593_v14, 1 }
 0x1c4   : > { %v608_v40 = vadd.f32 %v607_v26, %v606_v16 }
 0x1c5   : > { %v595_v31 = vadd.f32 %v594_v34, %v593_v14 }
 0x1f7   : > { %v318_v44 = vpop.xlane.xlu0 %317 }
 0x1f8   : > { %v319_v49 = vrot.slane %v318_v44, 4 }
 0x1fa   : > { %v320_v51 = vadd.f32 %v319_v49, %v318_v44 }
 0x1fb   : > { %v434_v11 = vpop.xlane.xlu0 %433 }
 0x1fc   : > { %v321_v55 = vrot.slane %v320_v51, 2  ;;  %v435_v56 = vrot.slane %v434_v11, 4 }
 0x1fe   : > { %v436_v59 = vadd.f32 %v435_v56, %v434_v11  ;;  %v322_v29 = vadd.f32 %v321_v55, %v320_v51 }
 0x200   : > { %v437_v62 = vrot.slane %v436_v59, 2  ;;  %v323_v63 = vrot.slane %v322_v29, 1 }
 0x201   : > { %v549_v5 = vpop.xlane.xlu1 %548 }
 0x202   : > { %v550_v6 = vrot.slane %v549_v5, 4  ;;  %v324_v35 = vadd.f32 %v323_v63, %v322_v29  ;;  %v438_v7 = vadd.f32 %v437_v62, %v436_v59 }
 0x204   : > { %v551_v8 = vadd.f32 %v550_v6, %v549_v5  ;;  %866 = vpush %v324_v35  ;;  %v439_v10 = vrot.slane %v438_v7, 1 }
 0x205   : > { %868 = vpush %v366_v25  ;;  %v678_v13 = vpop.xlane.xlu1 %677 }
 0x206   : > { %v552_v15 = vrot.slane %v551_v8, 2  ;;  %870 = vpush %v379_v9  ;;  %v679_v45 = vrot.slane %v678_v13, 4  ;;  %v440_v46 = vadd.f32 %v439_v10, %v438_v7 }
 0x208   : > { %v680_v18 = vadd.f32 %v679_v45, %v678_v13  ;;  %872 = vpush %v440_v46  ;;  %v553_v22 = vadd.f32 %v552_v15, %v551_v8 }
 0x209   : > { %874 = vpush %v481_v17  ;;  %v663_v37 = vpop.xlane.xlu0 %662 }
 0x20a   : > { %v681_v23 = vrot.slane %v680_v18, 2  ;;  %876 = vpush %v494_v21  ;;  %v664_v24 = vrot.slane %v663_v37, 4  ;;  %v554_v41 = vrot.slane %v553_v22, 1 }
 0x20c   : > { %v665_v39 = vadd.f32 %v664_v24, %v663_v37  ;;  %v555_v27 = vadd.f32 %v554_v41, %v553_v22  ;;  %v682_v28 = vadd.f32 %v681_v23, %v680_v18 }
 0x20d   : > { %v691_v30 = vpop.xlane.xlu0 %690 }
 0x20e   : > { %v666_v33 = vrot.slane %v665_v39, 2  ;;  %v692_v36 = vrot.slane %v691_v30, 4  ;;  %878 = vpush %v555_v27  ;;  %v683_v47 = vrot.slane %v682_v28, 1 }
 0x20f   : > { %880 = vpush %v595_v31 }
 0x210   : > { %v693_v44 = vadd.f32 %v692_v36, %v691_v30  ;;  %882 = vpush %v608_v40  ;;  %v667_v43 = vadd.f32 %v666_v33, %v665_v39  ;;  %v684_v51 = vadd.f32 %v683_v47, %v682_v28 }
 0x212   : > { %v694_v42 = vrot.slane %v693_v44, 2  ;;  %v668_v48 = vrot.slane %v667_v43, 1 }
 0x214   : > { %v695_v49 = vadd.f32 %v694_v42, %v693_v44  ;;  %v669_v50 = vadd.f32 %v668_v48, %v667_v43 }
 0x216   : > { %884 = vpush %v669_v50  ;;  %v696_v52 = vrot.slane %v695_v49, 1 }
 0x217   : > { %886 = vpush %v684_v51 }
 0x218   : > { %v697_v53 = vadd.f32 %v696_v52, %v695_v49 }
 0x21a   : > { %888 = vpush %v697_v53 }
 0x235   : > { %s867_s22 = spop %866 }
 0x236   : > { %s869_s24 = spop %868 }
 0x237   : > { %s871_s23 = spop %870  ;;  %s368_s10 = sadd.f32 %s869_s24, %s867_s22 }
 0x238   : > { %v706_v56 = vstv %s871_s23 }
 0x239   : > { %s873_s12 = spop %872  ;;  %v702_v54 = vstv %s368_s10 }
 0x23a   : > { %s875_s18 = spop %874  ;;  %v703_v20 = vsel %vm1502_vm14, %v702_v54, 0.0 }
 0x23b   : > { %s483_s7 = sadd.f32 %s875_s18, %s873_s12  ;;  %s877_s29 = spop %876  ;;  %v707_v57 = vsel %vm705_vm1, %v706_v56, %v703_v20 }
 0x23c   : > { %v713_v29 = vstv %s877_s29 }
 0x23d   : > { %v710_v55 = vstv %s483_s7 }
 0x23e   : > { %v711_v58 = vsel %vm709_vm2, %v710_v55, %v707_v57 }
 0x23f   : > { %s879_s4 = spop %878  ;;  %v714_v60 = vsel %vm712_vm4, %v713_v29, %v711_v58 }
 0x240   : > { %s881_s19 = spop %880 }
 0x241   : > { %s597_s25 = sadd.f32 %s881_s19, %s879_s4  ;;  %s883_s5 = spop %882 }
 0x242   : > { %v720_v62 = vstv %s883_s5 }
 0x243   : > { %v717_v19 = vstv %s597_s25 }
 0x244   : > { %v718_v61 = vsel %vm1521_vm5, %v717_v19, %v714_v60 }
 0x245   : > { %v721_v63 = vsel %vm719_vm7, %v720_v62, %v718_v61 }
 0x247   : > { %s885_s28 = spop %884 }
 0x248   : > { %s887_s21 = spop %886 }
 0x249   : > { %s686_s6 = sadd.f32 %s887_s21, %s885_s28 }
 0x24b   : > { %v724_v2 = vstv %s686_s6  ;;  %s889_s8 = spop %888 }
 0x24c   : > { %v725_v0 = vsel %vm723_vm8, %v724_v2, %v721_v63  ;;  %v727_v3 = vstv %s889_s8 }
 0x24d   : > { %v728_v4 = vsel %vm726_vm9, %v727_v3, %v725_v0 }
 0x24e   : > { %729 = vst [vmem:[%s265_s27] sm:$0xff] %v728_v4 }
 0x24f PF: > { %p16_p2 = scmp.ge.s32.totalorder %s1136_s17, 4   ;;  %s1577_s12 = smov %s1070_s13 }
 0x250   : > { %s1578_s13 = smov %s1074_s14  ;;  %s1579_s14 = smov %s1146_s20 }
 0x251   : > { %s1580_s15 = smov %s1136_s17  ;;  %18 = sbr.rel (!%p16_p2) target bundleno = 5 (0x5), region = 96 }
 0x258   :  { %749 = vsyncpa [#allocation3], 1 }
 0x259   :  { %751 = vsyncpa [#allocation3 + $0x1], 1 }
 0x25a   :  { %752 = vsyncpa [#allocation5], 1 }
 0x25b   :  { %754 = vsyncpa [#allocation5 + $0x1], 1 }

</bundles_post_ra>
